<compile_context>
chip_gen: v7x
topology: tpu7x:2x2x1
jax: 0.10.0
libtpu: 0.0.40
codegen_flags: <defaults>
</compile_context>

<pallas_src>
import jax
import jax.numpy as jnp
import numpy as np
from jax.experimental import pallas as pl
from jax.experimental.pallas import tpu as pltpu


def _round_up(x, m):
    return ((x + m - 1) // m) * m


def _num_tensorcores():
    """Best-effort TensorCore count per chip (v7x has 2, v5e/v6e have 1)."""
    try:
        kind = jax.devices()[0].device_kind.lower()
    except Exception:
        return 1
    return 2 if "v7" in kind else 1


def critic_kernel(state_ref, a1_ref, a2_ref,
                  w1_ref, b1_ref, w2_ref, b2_ref, w3_ref, b3_ref,
                  out_ref):
    f32 = jnp.float32

    # torch.cat([state + action_1 + action_2], 1) is a cat of a single tensor,
    # i.e. just the elementwise sum.
    x = state_ref[...] + a1_ref[...] + a2_ref[...]                # [TB, D] f32

    # Linear(D, H) + ReLU  (f32 operands, f32 accumulation on the MXU)
    h = jnp.dot(x, w1_ref[...], preferred_element_type=f32)
    h = jnp.maximum(h + b1_ref[...], 0.0)

    # Linear(H, H) + ReLU
    h = jnp.dot(h, w2_ref[...], preferred_element_type=f32)
    h = jnp.maximum(h + b2_ref[...], 0.0)

    # Linear(H, 1): VPU multiply by the single weight row + lane reduction.
    # Output block is the true (TB, 1) column; rows past B on the ragged last
    # tile are dropped by Pallas' out-of-bounds write handling.
    out_ref[...] = (jnp.sum(h * w3_ref[...], axis=-1, keepdims=True)
                    + b3_ref[...])


def critic_forward(state, action_1, action_2, params, *, tb=None, max_tb=1024):
    """state/action_i: [B, D] f32 (D = n_states + 2*n_actions) -> Q: [B, 1]."""
    B, D = state.shape
    H = params["w1"].shape[1]

    if tb is None:
        # One tile per TensorCore: grid=1 on v5e/v6e, grid=2 on v7x (capped
        # so very large batches still stream through a bounded VMEM tile).
        cores = _num_tensorcores()
        tb = min(max_tb, _round_up((B + cores - 1) // cores, 8))
    else:
        tb = _round_up(min(tb, _round_up(B, 8)), 8)
    n_tiles = (B + tb - 1) // tb

    x_spec = pl.BlockSpec((tb, D), lambda i: (i, 0))

    def resident(a):  # whole-array block, constant index -> stays in VMEM
        return pl.BlockSpec(a.shape, lambda i: (0,) * a.ndim)

    n_params = sum(int(np.prod(params[k].shape))
                   for k in ("w1", "b1", "w2", "b2", "w3", "b3"))
    cost = pl.CostEstimate(
        flops=2 * B * (D * H + H * H + H),
        transcendentals=0,
        bytes_accessed=4 * (3 * B * D + B + n_params),
    )

    return pl.pallas_call(
        critic_kernel,
        out_shape=jax.ShapeDtypeStruct((B, 1), jnp.float32),
        grid=(n_tiles,),
        in_specs=[x_spec, x_spec, x_spec,
                  resident(params["w1"]), resident(params["b1"]),
                  resident(params["w2"]), resident(params["b2"]),
                  resident(params["w3"]), resident(params["b3"])],
        out_specs=pl.BlockSpec((tb, 1), lambda i: (i, 0)),
        compiler_params=pltpu.CompilerParams(
            dimension_semantics=("parallel",)),
        cost_estimate=cost,
    )(state, action_1, action_2,
      params["w1"], params["b1"], params["w2"], params["b2"],
      params["w3"], params["b3"])


def init_params(key, n_states, n_actions, hidden_dim):
    """Deterministic synthetic params, stored as [in, out] / [1, out], all f32."""
    D = n_states + 2 * n_actions
    dims = [(D, hidden_dim), (hidden_dim, hidden_dim), (hidden_dim, 1)]
    keys = jax.random.split(key, 2 * len(dims))
    params = {}
    for i, (din, dout) in enumerate(dims):
        w = 0.1 * jax.random.normal(keys[2 * i], (din, dout), dtype=jnp.float32)
        b = 0.1 * jax.random.normal(keys[2 * i + 1], (1, dout), dtype=jnp.float32)
        params[f"w{i + 1}"] = w
        params[f"b{i + 1}"] = b
    # Last layer runs on the VPU as a lane reduction; store its weight as [1, H].
    params["w3"] = params["w3"].reshape(1, hidden_dim)
    return params


def critic_reference(state, action_1, action_2, params):
    """Pure-JAX f32 reference mirroring the PyTorch forward."""
    hi = jax.lax.Precision.HIGHEST
    x = state + action_1 + action_2
    h = jnp.dot(x, params["w1"], precision=hi) + params["b1"]
    h = jnp.maximum(h, 0.0)
    h = jnp.dot(h, params["w2"], precision=hi) + params["b2"]
    h = jnp.maximum(h, 0.0)
    return jnp.sum(h * params["w3"], axis=-1, keepdims=True) + params["b3"]


if __name__ == "__main__":
    n_states, n_actions, hidden_dim = 16, 4, 32
    D = n_states + 2 * n_actions          # 24
    batch = 500                           # ragged batch -> exercises OOB tail

    key = jax.random.PRNGKey(0)
    kp, ks, k1, k2 = jax.random.split(key, 4)
    params = init_params(kp, n_states, n_actions, hidden_dim)

    state = jax.random.normal(ks, (batch, D), dtype=jnp.float32)
    action_1 = jax.random.normal(k1, (batch, D), dtype=jnp.float32)
    action_2 = jax.random.normal(k2, (batch, D), dtype=jnp.float32)

    q = critic_forward(state, action_1, action_2, params)
    q = jax.block_until_ready(q)

    q_ref = critic_reference(state, action_1, action_2, params)
    assert q.shape == (batch, 1)
    # Tolerance covers TPU matmul-precision differences between the Mosaic
    # in-kernel f32 matmul and the XLA reference dot.
    np.testing.assert_allclose(np.asarray(q), np.asarray(q_ref),
                               rtol=5e-3, atol=5e-3)
    print("KERNEL_OK")
</pallas_src>

<mosaic_0001>
module attributes {stable_mosaic.version = 11 : i64} {
  func.func @critic_kernel(%arg0: i32, %arg1: memref<504x24xf32, #tpu.memory_space<vmem>>, %arg2: memref<504x24xf32, #tpu.memory_space<vmem>>, %arg3: memref<504x24xf32, #tpu.memory_space<vmem>>, %arg4: memref<24x32xf32, #tpu.memory_space<vmem>>, %arg5: memref<1x32xf32, #tpu.memory_space<vmem>>, %arg6: memref<32x32xf32, #tpu.memory_space<vmem>>, %arg7: memref<1x32xf32, #tpu.memory_space<vmem>>, %arg8: memref<1x32xf32, #tpu.memory_space<vmem>>, %arg9: memref<1x1xf32, #tpu.memory_space<vmem>>, %arg10: memref<504x1xf32, #tpu.memory_space<vmem>>) attributes {dimension_semantics = [#tpu.dimension_semantics<parallel>], iteration_bounds = array<i64: 1>, scalar_prefetch = 0 : i64, scratch_operands = 0 : i64, tpu.core_type = #tpu.core_type<tc>, window_params = [{transform_indices = @transform_0, window_bounds = array<i64: 504, 24>}, {transform_indices = @transform_1, window_bounds = array<i64: 504, 24>}, {transform_indices = @transform_2, window_bounds = array<i64: 504, 24>}, {pipeline_mode = #tpu.pipeline_mode<synchronous>, transform_indices = @transform_3, window_bounds = array<i64: 24, 32>}, {pipeline_mode = #tpu.pipeline_mode<synchronous>, transform_indices = @transform_4, window_bounds = array<i64: 1, 32>}, {pipeline_mode = #tpu.pipeline_mode<synchronous>, transform_indices = @transform_5, window_bounds = array<i64: 32, 32>}, {pipeline_mode = #tpu.pipeline_mode<synchronous>, transform_indices = @transform_6, window_bounds = array<i64: 1, 32>}, {pipeline_mode = #tpu.pipeline_mode<synchronous>, transform_indices = @transform_7, window_bounds = array<i64: 1, 32>}, {pipeline_mode = #tpu.pipeline_mode<synchronous>, transform_indices = @transform_8, window_bounds = array<i64: 1, 1>}, {transform_indices = @transform_9, window_bounds = array<i64: 504, 1>}]} {
    %c0 = arith.constant 0 : index
    %c0_0 = arith.constant 0 : index
    %0 = vector.load %arg1[%c0, %c0_0] : memref<504x24xf32, #tpu.memory_space<vmem>>, vector<504x24xf32>
    %c0_1 = arith.constant 0 : index
    %c0_2 = arith.constant 0 : index
    %1 = vector.load %arg2[%c0_1, %c0_2] : memref<504x24xf32, #tpu.memory_space<vmem>>, vector<504x24xf32>
    %2 = arith.addf %0, %1 : vector<504x24xf32>
    %c0_3 = arith.constant 0 : index
    %c0_4 = arith.constant 0 : index
    %3 = vector.load %arg3[%c0_3, %c0_4] : memref<504x24xf32, #tpu.memory_space<vmem>>, vector<504x24xf32>
    %4 = arith.addf %2, %3 : vector<504x24xf32>
    %c0_5 = arith.constant 0 : index
    %c0_6 = arith.constant 0 : index
    %5 = vector.load %arg4[%c0_5, %c0_6] : memref<24x32xf32, #tpu.memory_space<vmem>>, vector<24x32xf32>
    %cst = arith.constant dense<0.000000e+00> : vector<504x32xf32>
    %6 = tpu.matmul %4, %5, %cst {dimension_numbers = #tpu.dot_dimension_numbers<[1], [0], [0], [1], [0, 0, 1, 1], [], []>} : vector<504x24xf32>, vector<24x32xf32>, vector<504x32xf32> -> vector<504x32xf32>
    %c0_7 = arith.constant 0 : index
    %c0_8 = arith.constant 0 : index
    %7 = vector.load %arg5[%c0_7, %c0_8] : memref<1x32xf32, #tpu.memory_space<vmem>>, vector<1x32xf32>
    %8 = vector.broadcast %7 : vector<1x32xf32> to vector<504x32xf32>
    %9 = arith.addf %6, %8 : vector<504x32xf32>
    %cst_9 = arith.constant 0.000000e+00 : f32
    %10 = vector.broadcast %cst_9 : f32 to vector<504x32xf32>
    %11 = arith.maximumf %9, %10 : vector<504x32xf32>
    %c0_10 = arith.constant 0 : index
    %c0_11 = arith.constant 0 : index
    %12 = vector.load %arg6[%c0_10, %c0_11] : memref<32x32xf32, #tpu.memory_space<vmem>>, vector<32x32xf32>
    %cst_12 = arith.constant dense<0.000000e+00> : vector<504x32xf32>
    %13 = tpu.matmul %11, %12, %cst_12 {dimension_numbers = #tpu.dot_dimension_numbers<[1], [0], [0], [1], [0, 0, 1, 1], [], []>} : vector<504x32xf32>, vector<32x32xf32>, vector<504x32xf32> -> vector<504x32xf32>
    %c0_13 = arith.constant 0 : index
    %c0_14 = arith.constant 0 : index
    %14 = vector.load %arg7[%c0_13, %c0_14] : memref<1x32xf32, #tpu.memory_space<vmem>>, vector<1x32xf32>
    %15 = vector.broadcast %14 : vector<1x32xf32> to vector<504x32xf32>
    %16 = arith.addf %13, %15 : vector<504x32xf32>
    %cst_15 = arith.constant 0.000000e+00 : f32
    %17 = vector.broadcast %cst_15 : f32 to vector<504x32xf32>
    %18 = arith.maximumf %16, %17 : vector<504x32xf32>
    %c0_16 = arith.constant 0 : index
    %c0_17 = arith.constant 0 : index
    %19 = vector.load %arg8[%c0_16, %c0_17] : memref<1x32xf32, #tpu.memory_space<vmem>>, vector<1x32xf32>
    %20 = vector.broadcast %19 : vector<1x32xf32> to vector<504x32xf32>
    %21 = arith.mulf %18, %20 : vector<504x32xf32>
    %cst_18 = arith.constant dense<0.000000e+00> : vector<504xf32>
    %22 = vector.multi_reduction <add>, %21, %cst_18 [1] : vector<504x32xf32> to vector<504xf32>
    %23 = vector.shape_cast %22 : vector<504xf32> to vector<504x1xf32>
    %c0_19 = arith.constant 0 : index
    %c0_20 = arith.constant 0 : index
    %24 = vector.load %arg9[%c0_19, %c0_20] : memref<1x1xf32, #tpu.memory_space<vmem>>, vector<1x1xf32>
    %25 = vector.broadcast %24 : vector<1x1xf32> to vector<504x1xf32>
    %26 = arith.addf %23, %25 : vector<504x1xf32>
    %c0_21 = arith.constant 0 : index
    %c0_22 = arith.constant 0 : index
    %27 = vector.load %arg10[%c0_21, %c0_22] : memref<504x1xf32, #tpu.memory_space<vmem>>, vector<504x1xf32>
    tpu.vector_store %arg10[%c0_21, %c0_22], %26 {strides = array<i32>} : memref<504x1xf32, #tpu.memory_space<vmem>>, vector<504x1xf32>,
    return
  }
  func.func @transform_0(%arg0: i32) -> (i32, i32) {
    %c0_i32 = arith.constant 0 : i32
    %c0_i32_0 = arith.constant 0 : i32
    return %arg0, %c0_i32 : i32, i32
  }
  func.func @transform_1(%arg0: i32) -> (i32, i32) {
    %c0_i32 = arith.constant 0 : i32
    %c0_i32_0 = arith.constant 0 : i32
    return %arg0, %c0_i32 : i32, i32
  }
  func.func @transform_2(%arg0: i32) -> (i32, i32) {
    %c0_i32 = arith.constant 0 : i32
    %c0_i32_0 = arith.constant 0 : i32
    return %arg0, %c0_i32 : i32, i32
  }
  func.func @transform_3(%arg0: i32) -> (i32, i32) {
    %c0_i32 = arith.constant 0 : i32
    %c0_i32_0 = arith.constant 0 : i32
    %c0_i32_1 = arith.constant 0 : i32
    return %c0_i32, %c0_i32_0 : i32, i32
  }
  func.func @transform_4(%arg0: i32) -> (i32, i32) {
    %c0_i32 = arith.constant 0 : i32
    %c0_i32_0 = arith.constant 0 : i32
    %c0_i32_1 = arith.constant 0 : i32
    return %c0_i32, %c0_i32_0 : i32, i32
  }
  func.func @transform_5(%arg0: i32) -> (i32, i32) {
    %c0_i32 = arith.constant 0 : i32
    %c0_i32_0 = arith.constant 0 : i32
    %c0_i32_1 = arith.constant 0 : i32
    return %c0_i32, %c0_i32_0 : i32, i32
  }
  func.func @transform_6(%arg0: i32) -> (i32, i32) {
    %c0_i32 = arith.constant 0 : i32
    %c0_i32_0 = arith.constant 0 : i32
    %c0_i32_1 = arith.constant 0 : i32
    return %c0_i32, %c0_i32_0 : i32, i32
  }
  func.func @transform_7(%arg0: i32) -> (i32, i32) {
    %c0_i32 = arith.constant 0 : i32
    %c0_i32_0 = arith.constant 0 : i32
    %c0_i32_1 = arith.constant 0 : i32
    return %c0_i32, %c0_i32_0 : i32, i32
  }
  func.func @transform_8(%arg0: i32) -> (i32, i32) {
    %c0_i32 = arith.constant 0 : i32
    %c0_i32_0 = arith.constant 0 : i32
    %c0_i32_1 = arith.constant 0 : i32
    return %c0_i32, %c0_i32_0 : i32, i32
  }
  func.func @transform_9(%arg0: i32) -> (i32, i32) {
    %c0_i32 = arith.constant 0 : i32
    %c0_i32_0 = arith.constant 0 : i32
    return %arg0, %c0_i32 : i32, i32
  }
}

</mosaic_0001>

<bundles_post_ra>
// kernel: tpu_custom_call.1
= control target key start
LH: loop header
LB: loop body
LE: loop exit
PB: predicated region body
PF: predicated region fallthrough
CT: control target
= control target key end

     0   :  { %v2702_v0 = vmov 0.0|0.0   ;;  %vm2703_vm0 = vmmov 0   ;;  %v2704_v3 = vmov 0.0   ;;  %vm359_vm1 = vcmask 195584   ;;  %s4304_s3 = inlined_call_operand.vmem [shape: f32[24,32], index: 3, kind: input, shape index: {}]   ;;  %s4305_s0 = inlined_call_operand.vmem [shape: f32[500,24], index: 0, kind: input, shape index: {}]   ;;  %s4306_s1 = inlined_call_operand.vmem [shape: f32[500,24], index: 1, kind: input, shape index: {}]   ;;  %s4307_s2 = inlined_call_operand.vmem [shape: f32[500,24], index: 2, kind: input, shape index: {}]   ;;  %s4308_s5 = inlined_call_operand.vmem [shape: f32[32,32], index: 5, kind: input, shape index: {}]   ;;  %s4309_s4 = inlined_call_operand.vmem [shape: f32[1,32], index: 4, kind: input, shape index: {}]   ;;  %s4310_s6 = inlined_call_operand.vmem [shape: f32[1,32], index: 6, kind: input, shape index: {}]   ;;  %s4311_s7 = inlined_call_operand.vmem [shape: f32[1,32], index: 7, kind: input, shape index: {}]   ;;  %s4312_s8 = inlined_call_operand.<no memory space> [shape: f32[1,1], index: 8, kind: input, shape index: {}]   ;;  %s4313_s9 = inlined_call_operand.vmem [shape: f32[500,1], index: 9, kind: output, shape index: {}]  }
   0x1   :  { %2688 = vmatprep.subr.bf16.mxu0 %v2702_v0  ;;  %v349_v1 = vld [vmem:[%s4304_s3] sm:$0xff]  ;;  %v350_v2 = vld [vmem:[%s4304_s3 + $0x8] sm:$0xff]  ;;  %2302 = vmatprep.mubr.msk.f32.mxu0 %vm2703_vm0, %v2704_v3  ;;  %v351_v11 = vld [vmem:[%s4304_s3 + $0x10] sm:$0xff]  ;;  %vm1003_vm2 = vcmask 261120   ;;  %vm1965_vm3 = vcmask 7168  }
   0x2   :  { %v2689_v4 = vpack.c.bf16 %v350_v2, %v349_v1  ;;  %v34_v5 = vld [vmem:[%s4305_s0] sm:$0xff]  ;;  %2691 = vmatprep.subr.bf16.mxu1 %v2702_v0  ;;  %2499 = vmatprep.mubr.msk.f32.mxu1 %vm2703_vm0, %v2704_v3  ;;  %v35_v9 = vld [vmem:[%s4305_s0 + $0x8] sm:$0xff]  ;;  %v36_v15 = vld [vmem:[%s4305_s0 + $0x10] sm:$0xff] }
   0x3   :  { %v97_v6 = vld [vmem:[%s4306_s1] sm:$0xff]  ;;  %v98_v10 = vld [vmem:[%s4306_s1 + $0x8] sm:$0xff]  ;;  %v99_v16 = vld [vmem:[%s4306_s1 + $0x10] sm:$0xff] }
   0x4   :  { %v223_v7 = vld [vmem:[%s4307_s2] sm:$0xff]  ;;  %v160_v8 = vadd.f32 %v97_v6, %v34_v5  ;;  %2690 = vmatpush3.bf16.msra.mxu0 %v2689_v4  ;;  %v161_v13 = vadd.f32 %v98_v10, %v35_v9  ;;  %v224_v14 = vld [vmem:[%s4307_s2 + $0x8] sm:$0xff]  ;;  %v162_v18 = vadd.f32 %v99_v16, %v36_v15  ;;  %v225_v19 = vld [vmem:[%s4307_s2 + $0x10] sm:$0xff] }
   0x5   :  { %2300 = vmatprep.subr.mxu0 %v2704_v3  ;;  %v37_v20 = vld [vmem:[%s4305_s0 + $0x18] sm:$0xff]  ;;  %v38_v25 = vld [vmem:[%s4305_s0 + $0x20] sm:$0xff]  ;;  %v39_v30 = vld [vmem:[%s4305_s0 + $0x28] sm:$0xff] }
   0x6   :  { %v286_v12 = vadd.f32 %v223_v7, %v160_v8  ;;  %v287_v17 = vadd.f32 %v224_v14, %v161_v13  ;;  %v100_v21 = vld [vmem:[%s4306_s1 + $0x18] sm:$0xff]  ;;  %v288_v22 = vadd.f32 %v225_v19, %v162_v18  ;;  %v101_v26 = vld [vmem:[%s4306_s1 + $0x20] sm:$0xff]  ;;  %v102_v31 = vld [vmem:[%s4306_s1 + $0x28] sm:$0xff] }
   0x7   :  { %v163_v23 = vadd.f32 %v100_v21, %v37_v20  ;;  %v226_v24 = vld [vmem:[%s4307_s2 + $0x18] sm:$0xff]  ;;  %v164_v28 = vadd.f32 %v101_v26, %v38_v25  ;;  %v227_v29 = vld [vmem:[%s4307_s2 + $0x20] sm:$0xff]  ;;  %v165_v33 = vadd.f32 %v102_v31, %v39_v30  ;;  %v228_v34 = vld [vmem:[%s4307_s2 + $0x28] sm:$0xff] }
   0x8   :  { %2301 = vmatpush3.msra.mxu0 %v351_v11  ;;  %v40_v35 = vld [vmem:[%s4305_s0 + $0x30] sm:$0xff]  ;;  %v41_v40 = vld [vmem:[%s4305_s0 + $0x38] sm:$0xff]  ;;  %v42_v45 = vld [vmem:[%s4305_s0 + $0x40] sm:$0xff] }
   0x9   :  { %2303 = vmatmul.mubr.msk.f32.vlgmr.msra.gmra.mrb[0].mxu0 %vm359_vm1, %v286_v12  ;;  %v289_v27 = vadd.f32 %v226_v24, %v163_v23  ;;  %v290_v32 = vadd.f32 %v227_v29, %v164_v28  ;;  %v103_v36 = vld [vmem:[%s4306_s1 + $0x30] sm:$0xff]  ;;  %v291_v37 = vadd.f32 %v228_v34, %v165_v33  ;;  %v104_v41 = vld [vmem:[%s4306_s1 + $0x38] sm:$0xff]  ;;  %v105_v46 = vld [vmem:[%s4306_s1 + $0x40] sm:$0xff] }
   0xa   :  { %2305 = vmatprep.mubr.msk.f32.mxu0 %vm2703_vm0, %v2704_v3  ;;  %v166_v38 = vadd.f32 %v103_v36, %v40_v35  ;;  %v229_v39 = vld [vmem:[%s4307_s2 + $0x30] sm:$0xff]  ;;  %v167_v43 = vadd.f32 %v104_v41, %v41_v40  ;;  %v230_v44 = vld [vmem:[%s4307_s2 + $0x38] sm:$0xff]  ;;  %v168_v48 = vadd.f32 %v105_v46, %v42_v45  ;;  %v231_v49 = vld [vmem:[%s4307_s2 + $0x40] sm:$0xff] }
   0xb   :  { %v43_v50 = vld [vmem:[%s4305_s0 + $0x48] sm:$0xff]  ;;  %v44_v55 = vld [vmem:[%s4305_s0 + $0x50] sm:$0xff]  ;;  %v45_v60 = vld [vmem:[%s4305_s0 + $0x58] sm:$0xff] }
   0xc   :  { %v292_v42 = vadd.f32 %v229_v39, %v166_v38  ;;  %v293_v47 = vadd.f32 %v230_v44, %v167_v43  ;;  %v106_v51 = vld [vmem:[%s4306_s1 + $0x48] sm:$0xff]  ;;  %v294_v52 = vadd.f32 %v231_v49, %v168_v48  ;;  %v107_v56 = vld [vmem:[%s4306_s1 + $0x50] sm:$0xff]  ;;  %v108_v61 = vld [vmem:[%s4306_s1 + $0x58] sm:$0xff] }
   0xd   :  { %2306 = vmatmul.mubr.msk.f32.gmra.mrb[2].mxu0 %vm359_vm1, %v287_v17  ;;  %v169_v53 = vadd.f32 %v106_v51, %v43_v50  ;;  %v232_v54 = vld [vmem:[%s4307_s2 + $0x48] sm:$0xff]  ;;  %v170_v58 = vadd.f32 %v107_v56, %v44_v55  ;;  %v233_v59 = vld [vmem:[%s4307_s2 + $0x50] sm:$0xff]  ;;  %v171_v63 = vadd.f32 %v108_v61, %v45_v60  ;;  %v234_v1 = vld [vmem:[%s4307_s2 + $0x58] sm:$0xff] }
   0xe   :  { %2308 = vmatprep.mubr.msk.f32.mxu0 %vm2703_vm0, %v2704_v3  ;;  %v46_v2 = vld [vmem:[%s4305_s0 + $0x60] sm:$0xff]  ;;  %v47_v8 = vld [vmem:[%s4305_s0 + $0x68] sm:$0xff]  ;;  %v48_v13 = vld [vmem:[%s4305_s0 + $0x70] sm:$0xff] }
   0xf   :  { %v295_v57 = vadd.f32 %v232_v54, %v169_v53  ;;  %v296_v62 = vadd.f32 %v233_v59, %v170_v58  ;;  %v109_v4 = vld [vmem:[%s4306_s1 + $0x60] sm:$0xff]  ;;  %v297_v5 = vadd.f32 %v234_v1, %v171_v63  ;;  %v110_v9 = vld [vmem:[%s4306_s1 + $0x68] sm:$0xff]  ;;  %v111_v14 = vld [vmem:[%s4306_s1 + $0x70] sm:$0xff] }
  0x10   :  { %v172_v6 = vadd.f32 %v109_v4, %v46_v2  ;;  %v235_v7 = vld [vmem:[%s4307_s2 + $0x60] sm:$0xff]  ;;  %v173_v11 = vadd.f32 %v110_v9, %v47_v8  ;;  %v236_v12 = vld [vmem:[%s4307_s2 + $0x68] sm:$0xff]  ;;  %v174_v16 = vadd.f32 %v111_v14, %v48_v13  ;;  %v237_v17 = vld [vmem:[%s4307_s2 + $0x70] sm:$0xff] }
  0x11   :  { %2309 = vmatmul.mubr.msk.f32.gmra.mrb[4].mxu0 %vm359_vm1, %v288_v22  ;;  %v49_v18 = vld [vmem:[%s4305_s0 + $0x78] sm:$0xff]  ;;  %v50_v23 = vld [vmem:[%s4305_s0 + $0x80] sm:$0xff]  ;;  %v51_v28 = vld [vmem:[%s4305_s0 + $0x88] sm:$0xff] }
  0x12   :  { %2311 = vmatprep.mubr.msk.f32.mxu0 %vm2703_vm0, %v2704_v3  ;;  %v298_v10 = vadd.f32 %v235_v7, %v172_v6  ;;  %v299_v15 = vadd.f32 %v236_v12, %v173_v11  ;;  %v112_v19 = vld [vmem:[%s4306_s1 + $0x78] sm:$0xff]  ;;  %v300_v20 = vadd.f32 %v237_v17, %v174_v16  ;;  %v113_v24 = vld [vmem:[%s4306_s1 + $0x80] sm:$0xff]  ;;  %v114_v29 = vld [vmem:[%s4306_s1 + $0x88] sm:$0xff] }
  0x13   :  { %v175_v21 = vadd.f32 %v112_v19, %v49_v18  ;;  %v238_v22 = vld [vmem:[%s4307_s2 + $0x78] sm:$0xff]  ;;  %v176_v26 = vadd.f32 %v113_v24, %v50_v23  ;;  %v177_v31 = vadd.f32 %v114_v29, %v51_v28  ;;  %v52_v33 = vld [vmem:[%s4305_s0 + $0x90] sm:$0xff]  ;;  %v54_v43 = vld [vmem:[%s4305_s0 + $0xa0] sm:$0xff] }
  0x14   :  { %v115_v34 = vld [vmem:[%s4306_s1 + $0x90] sm:$0xff]  ;;  %v53_v38 = vld [vmem:[%s4305_s0 + $0x98] sm:$0xff]  ;;  %v117_v44 = vld [vmem:[%s4306_s1 + $0xa0] sm:$0xff] }
  0x15   :  { %2312 = vmatmul.mubr.msk.f32.gmra.mrb[6].mxu0 %vm359_vm1, %v289_v27  ;;  %v301_v25 = vadd.f32 %v238_v22, %v175_v21  ;;  %v239_v27 = vld [vmem:[%s4307_s2 + $0x80] sm:$0xff]  ;;  %v178_v36 = vadd.f32 %v115_v34, %v52_v33  ;;  %v116_v39 = vld [vmem:[%s4306_s1 + $0x98] sm:$0xff]  ;;  %v180_v46 = vadd.f32 %v117_v44, %v54_v43  ;;  %v55_v48 = vld [vmem:[%s4305_s0 + $0xa8] sm:$0xff] }
  0x16   :  { %2314 = vmatprep.mubr.msk.f32.mxu0 %vm2703_vm0, %v2704_v3  ;;  %v302_v30 = vadd.f32 %v239_v27, %v176_v26  ;;  %v179_v41 = vadd.f32 %v116_v39, %v53_v38  ;;  %v118_v49 = vld [vmem:[%s4306_s1 + $0xa8] sm:$0xff]  ;;  %v56_v53 = vld [vmem:[%s4305_s0 + $0xb0] sm:$0xff]  ;;  %v992_v55 = vld [vmem:[%s4308_s5] sm:$0xff] }
  0x17   :  { %v181_v51 = vadd.f32 %v118_v49, %v55_v48  ;;  %v119_v54 = vld [vmem:[%s4306_s1 + $0xb0] sm:$0xff]  ;;  %v993_v56 = vld [vmem:[%s4308_s5 + $0x8] sm:$0xff]  ;;  %v57_v61 = vld [vmem:[%s4305_s0 + $0xb8] sm:$0xff] }
  0x18   :  { %v182_v59 = vadd.f32 %v119_v54, %v56_v53  ;;  %v245_v60 = vld [vmem:[%s4307_s2 + $0xb0] sm:$0xff]  ;;  %v995_v1 = vld [vmem:[%s4308_s5 + $0x18] sm:$0xff]  ;;  %v58_v6 = vld [vmem:[%s4305_s0 + $0xc0] sm:$0xff] }
  0x19   :  { %2315 = vmatmul.mubr.msk.f32.gmra.mrb[8].mxu0 %vm359_vm1, %v290_v32  ;;  %v240_v32 = vld [vmem:[%s4307_s2 + $0x88] sm:$0xff]  ;;  %v994_v63 = vld [vmem:[%s4308_s5 + $0x10] sm:$0xff]  ;;  %v121_v7 = vld [vmem:[%s4306_s1 + $0xc0] sm:$0xff] }
  0x1a   :  { %2317 = vmatprep.mubr.msk.f32.mxu0 %vm2703_vm0, %v2704_v3  ;;  %v303_v35 = vadd.f32 %v240_v32, %v177_v31  ;;  %v2695_v2 = vpack.c.bf16 %v995_v1, %v994_v63  ;;  %v308_v4 = vadd.f32 %v245_v60, %v182_v59  ;;  %v184_v9 = vadd.f32 %v121_v7, %v58_v6  ;;  %v59_v11 = vld [vmem:[%s4305_s0 + $0xc8] sm:$0xff]  ;;  %v60_v16 = vld [vmem:[%s4305_s0 + $0xd0] sm:$0xff]  ;;  %v61_v21 = vld [vmem:[%s4305_s0 + $0xd8] sm:$0xff] }
  0x1b   :  { %v122_v12 = vld [vmem:[%s4306_s1 + $0xc8] sm:$0xff]  ;;  %v123_v17 = vld [vmem:[%s4306_s1 + $0xd0] sm:$0xff]  ;;  %v124_v22 = vld [vmem:[%s4306_s1 + $0xd8] sm:$0xff] }
  0x1c   :  { %v185_v14 = vadd.f32 %v122_v12, %v59_v11  ;;  %v186_v19 = vadd.f32 %v123_v17, %v60_v16  ;;  %v187_v24 = vadd.f32 %v124_v22, %v61_v21  ;;  %v62_v26 = vld [vmem:[%s4305_s0 + $0xe0] sm:$0xff]  ;;  %v63_v31 = vld [vmem:[%s4305_s0 + $0xe8] sm:$0xff]  ;;  %v257_v60 = vld [vmem:[%s4307_s2 + $0x110] sm:$0xff] }
  0x1d   :  { %2318 = vmatmul.mubr.msk.f32.gmra.mrb[10].mxu0 %vm359_vm1, %v291_v37  ;;  %v241_v37 = vld [vmem:[%s4307_s2 + $0x90] sm:$0xff]  ;;  %v125_v27 = vld [vmem:[%s4306_s1 + $0xe0] sm:$0xff]  ;;  %v126_v32 = vld [vmem:[%s4306_s1 + $0xe8] sm:$0xff] }
  0x1e   :  { %2320 = vmatprep.mubr.msk.f32.mxu0 %vm2703_vm0, %v2704_v3  ;;  %v304_v40 = vadd.f32 %v241_v37, %v178_v36  ;;  %v188_v29 = vadd.f32 %v125_v27, %v62_v26  ;;  %v189_v34 = vadd.f32 %v126_v32, %v63_v31  ;;  %v64_v36 = vld [vmem:[%s4305_s0 + $0xf0] sm:$0xff]  ;;  %v259_v7 = vld [vmem:[%s4307_s2 + $0x120] sm:$0xff]  ;;  %v260_v12 = vld [vmem:[%s4307_s2 + $0x128] sm:$0xff] }
  0x1f   :  { %v127_v37 = vld [vmem:[%s4306_s1 + $0xf0] sm:$0xff]  ;;  %v262_v22 = vld [vmem:[%s4307_s2 + $0x138] sm:$0xff]  ;;  %v263_v27 = vld [vmem:[%s4307_s2 + $0x140] sm:$0xff] }
  0x20   :  { %v190_v39 = vadd.f32 %v127_v37, %v64_v36  ;;  %v261_v17 = vld [vmem:[%s4307_s2 + $0x130] sm:$0xff]  ;;  %v264_v32 = vld [vmem:[%s4307_s2 + $0x148] sm:$0xff] }
  0x21   :  { %2321 = vmatmul.mubr.msk.f32.gmra.mrb[12].mxu0 %vm359_vm1, %v292_v42  ;;  %v242_v42 = vld [vmem:[%s4307_s2 + $0x98] sm:$0xff]  ;;  %v265_v37 = vld [vmem:[%s4307_s2 + $0x150] sm:$0xff] }
  0x22   :  { %2323 = vmatprep.mubr.msk.f32.mxu0 %vm2703_vm0, %v2704_v3  ;;  %v305_v45 = vadd.f32 %v242_v42, %v179_v41  ;;  %v65_v41 = vld [vmem:[%s4305_s0 + $0xf8] sm:$0xff] }
  0x23   :  { %v128_v42 = vld [vmem:[%s4306_s1 + $0xf8] sm:$0xff] }
  0x24   :  { %v191_v44 = vadd.f32 %v128_v42, %v65_v41  ;;  %v266_v42 = vld [vmem:[%s4307_s2 + $0x158] sm:$0xff] }
  0x25   :  { %2324 = vmatmul.mubr.msk.f32.gmra.mrb[14].mxu0 %vm359_vm1, %v293_v47  ;;  %v243_v47 = vld [vmem:[%s4307_s2 + $0xa0] sm:$0xff] }
  0x26   :  { %2326 = vmatprep.mubr.msk.f32.mxu0 %vm2703_vm0, %v2704_v3  ;;  %v306_v50 = vadd.f32 %v243_v47, %v180_v46  ;;  %v66_v46 = vld [vmem:[%s4305_s0 + $0x100] sm:$0xff] }
  0x27   :  { %v129_v47 = vld [vmem:[%s4306_s1 + $0x100] sm:$0xff] }
  0x28   :  { %v192_v49 = vadd.f32 %v129_v47, %v66_v46  ;;  %v267_v47 = vld [vmem:[%s4307_s2 + $0x160] sm:$0xff] }
  0x29   :  { %2327 = vmatmul.mubr.msk.f32.gmra.mrb[16].mxu0 %vm359_vm1, %v294_v52  ;;  %v244_v52 = vld [vmem:[%s4307_s2 + $0xa8] sm:$0xff] }
  0x2a   :  { %2329 = vmatprep.mubr.msk.f32.mxu0 %vm2703_vm0, %v2704_v3  ;;  %v307_v58 = vadd.f32 %v244_v52, %v181_v51  ;;  %v67_v51 = vld [vmem:[%s4305_s0 + $0x108] sm:$0xff] }
  0x2b   :  { %v130_v52 = vld [vmem:[%s4306_s1 + $0x108] sm:$0xff] }
  0x2c   :  { %v193_v54 = vadd.f32 %v130_v52, %v67_v51  ;;  %v268_v52 = vld [vmem:[%s4307_s2 + $0x168] sm:$0xff] }
  0x2d   :  { %2330 = vmatmul.mubr.msk.f32.gmra.mrb[18].mxu0 %vm359_vm1, %v295_v57  ;;  %v2692_v57 = vpack.c.bf16 %v993_v56, %v992_v55  ;;  %v256_v55 = vld [vmem:[%s4307_s2 + $0x108] sm:$0xff]  ;;  %v68_v56 = vld [vmem:[%s4305_s0 + $0x110] sm:$0xff] }
  0x2e   :  { %2332 = vmatprep.mubr.msk.f32.mxu0 %vm2703_vm0, %v2704_v3 }
  0x2f   :  { %2693 = vmatpush3.bf16.msra.mxu1 %v2692_v57  ;;  %v131_v57 = vld [vmem:[%s4306_s1 + $0x110] sm:$0xff] }
  0x30   :  { %2694 = vmatprep.subr.bf16.mxu1 %v2702_v0  ;;  %v246_v0 = vld [vmem:[%s4307_s2 + $0xb8] sm:$0xff]  ;;  %v194_v59 = vadd.f32 %v131_v57, %v68_v56  ;;  %v269_v57 = vld [vmem:[%s4307_s2 + $0x170] sm:$0xff] }
  0x31   :  { %2333 = vmatmul.mubr.msk.f32.gmra.mrb[20].mxu0 %vm359_vm1, %v296_v62  ;;  %v120_v62 = vld [vmem:[%s4306_s1 + $0xb8] sm:$0xff] }
  0x32   :  { %2335 = vmatprep.mubr.msk.f32.mxu0 %vm2703_vm0, %v2704_v3  ;;  %v320_v63 = vadd.f32 %v257_v60, %v194_v59  ;;  %v144_v59 = vld [vmem:[%s4306_s1 + $0x178] sm:$0xff] }
  0x33   :  { %2696 = vmatpush3.bf16.msra.mxu1 %v2695_v2  ;;  %v258_v2 = vld [vmem:[%s4307_s2 + $0x118] sm:$0xff] }
  0x35   :  { %2336 = vmatmul.mubr.msk.f32.gmra.mrb[22].mxu0 %vm359_vm1, %v297_v5  ;;  %v183_v5 = vadd.f32 %v120_v62, %v57_v61  ;;  %v69_v61 = vld [vmem:[%s4305_s0 + $0x118] sm:$0xff] }
  0x36   :  { %2338 = vmatprep.mubr.msk.f32.mxu0 %vm2703_vm0, %v2704_v3  ;;  %v132_v62 = vld [vmem:[%s4306_s1 + $0x118] sm:$0xff] }
  0x37   :  { %v309_v8 = vadd.f32 %v246_v0, %v183_v5  ;;  %v195_v1 = vadd.f32 %v132_v62, %v69_v61  ;;  %v133_v5 = vld [vmem:[%s4306_s1 + $0x120] sm:$0xff]  ;;  %v270_v62 = vld [vmem:[%s4307_s2 + $0x178] sm:$0xff] }
  0x39   :  { %2339 = vmatmul.mubr.msk.f32.gmra.mrb[24].mxu0 %vm359_vm1, %v298_v10  ;;  %v247_v10 = vld [vmem:[%s4307_s2 + $0xc0] sm:$0xff]  ;;  %v321_v0 = vadd.f32 %v258_v2, %v195_v1 }
  0x3a   :  { %2341 = vmatprep.mubr.msk.f32.mxu0 %vm2703_vm0, %v2704_v3  ;;  %v310_v13 = vadd.f32 %v247_v10, %v184_v9  ;;  %v134_v9 = vld [vmem:[%s4306_s1 + $0x128] sm:$0xff]  ;;  %v145_v1 = vld [vmem:[%s4306_s1 + $0x180] sm:$0xff] }
  0x3d   :  { %2342 = vmatmul.mubr.msk.f32.gmra.mrb[26].mxu0 %vm359_vm1, %v299_v15  ;;  %v248_v15 = vld [vmem:[%s4307_s2 + $0xc8] sm:$0xff] }
  0x3e   :  { %2344 = vmatprep.mubr.msk.f32.mxu0 %vm2703_vm0, %v2704_v3  ;;  %v311_v18 = vadd.f32 %v248_v15, %v185_v14  ;;  %v135_v14 = vld [vmem:[%s4306_s1 + $0x130] sm:$0xff] }
  0x41   :  { %2345 = vmatmul.mubr.msk.f32.gmra.mrb[28].mxu0 %vm359_vm1, %v300_v20  ;;  %v249_v20 = vld [vmem:[%s4307_s2 + $0xd0] sm:$0xff] }
  0x42   :  { %2347 = vmatprep.mubr.msk.f32.mxu0 %vm2703_vm0, %v2704_v3  ;;  %v312_v23 = vadd.f32 %v249_v20, %v186_v19  ;;  %v136_v19 = vld [vmem:[%s4306_s1 + $0x138] sm:$0xff] }
  0x45   :  { %2348 = vmatmul.mubr.msk.f32.gmra.mrb[30].mxu0 %vm359_vm1, %v301_v25  ;;  %v250_v25 = vld [vmem:[%s4307_s2 + $0xd8] sm:$0xff] }
  0x46   :  { %2350 = vmatprep.mubr.msk.f32.mxu0 %vm2703_vm0, %v2704_v3  ;;  %v313_v28 = vadd.f32 %v250_v25, %v187_v24  ;;  %v137_v24 = vld [vmem:[%s4306_s1 + $0x140] sm:$0xff] }
  0x49   :  { %2351 = vmatmul.mubr.msk.f32.gmra.mrb[32].mxu0 %vm359_vm1, %v302_v30  ;;  %v251_v30 = vld [vmem:[%s4307_s2 + $0xe0] sm:$0xff] }
  0x4a   :  { %2353 = vmatprep.mubr.msk.f32.mxu0 %vm2703_vm0, %v2704_v3  ;;  %v314_v33 = vadd.f32 %v251_v30, %v188_v29  ;;  %v138_v29 = vld [vmem:[%s4306_s1 + $0x148] sm:$0xff] }
  0x4d   :  { %2354 = vmatmul.mubr.msk.f32.gmra.mrb[34].mxu0 %vm359_vm1, %v303_v35  ;;  %v252_v35 = vld [vmem:[%s4307_s2 + $0xe8] sm:$0xff] }
  0x4e   :  { %2356 = vmatprep.mubr.msk.f32.mxu0 %vm2703_vm0, %v2704_v3  ;;  %v315_v38 = vadd.f32 %v252_v35, %v189_v34  ;;  %v139_v34 = vld [vmem:[%s4306_s1 + $0x150] sm:$0xff] }
  0x51   :  { %2357 = vmatmul.mubr.msk.f32.gmra.mrb[36].mxu0 %vm359_vm1, %v304_v40  ;;  %v253_v40 = vld [vmem:[%s4307_s2 + $0xf0] sm:$0xff] }
  0x52   :  { %2359 = vmatprep.mubr.msk.f32.mxu0 %vm2703_vm0, %v2704_v3  ;;  %v316_v43 = vadd.f32 %v253_v40, %v190_v39  ;;  %v140_v39 = vld [vmem:[%s4306_s1 + $0x158] sm:$0xff] }
  0x55   :  { %2360 = vmatmul.mubr.msk.f32.gmra.mrb[38].mxu0 %vm359_vm1, %v305_v45  ;;  %v254_v45 = vld [vmem:[%s4307_s2 + $0xf8] sm:$0xff] }
  0x56   :  { %2362 = vmatprep.mubr.msk.f32.mxu0 %vm2703_vm0, %v2704_v3  ;;  %v317_v48 = vadd.f32 %v254_v45, %v191_v44  ;;  %v141_v44 = vld [vmem:[%s4306_s1 + $0x160] sm:$0xff] }
  0x59   :  { %2363 = vmatmul.mubr.msk.f32.gmra.mrb[40].mxu0 %vm359_vm1, %v306_v50  ;;  %v255_v50 = vld [vmem:[%s4307_s2 + $0x100] sm:$0xff] }
  0x5a   :  { %2365 = vmatprep.mubr.msk.f32.mxu0 %vm2703_vm0, %v2704_v3  ;;  %v318_v53 = vadd.f32 %v255_v50, %v192_v49  ;;  %v142_v49 = vld [vmem:[%s4306_s1 + $0x168] sm:$0xff] }
  0x5d   :  { %2366 = vmatmul.mubr.msk.f32.gmra.mrb[42].mxu0 %vm359_vm1, %v307_v58  ;;  %v319_v58 = vadd.f32 %v256_v55, %v193_v54  ;;  %v143_v54 = vld [vmem:[%s4306_s1 + $0x170] sm:$0xff] }
  0x5e   :  { %2368 = vmatprep.mubr.msk.f32.mxu0 %vm2703_vm0, %v2704_v3 }
  0x61   :  { %2369 = vmatmul.mubr.msk.f32.gmra.mrb[44].mxu0 %vm359_vm1, %v308_v4  ;;  %v70_v4 = vld [vmem:[%s4305_s0 + $0x120] sm:$0xff] }
  0x62   :  { %2371 = vmatprep.mubr.msk.f32.mxu0 %vm2703_vm0, %v2704_v3  ;;  %v196_v6 = vadd.f32 %v133_v5, %v70_v4  ;;  %v271_v5 = vld [vmem:[%s4307_s2 + $0x180] sm:$0xff] }
  0x64   :  { %v322_v10 = vadd.f32 %v259_v7, %v196_v6  ;;  %v146_v6 = vld [vmem:[%s4306_s1 + $0x188] sm:$0xff] }
  0x65   :  { %2372 = vmatmul.mubr.msk.f32.gmra.mrb[46].mxu0 %vm359_vm1, %v309_v8  ;;  %v71_v8 = vld [vmem:[%s4305_s0 + $0x128] sm:$0xff] }
  0x66   :  { %2374 = vmatprep.mubr.msk.f32.mxu0 %vm2703_vm0, %v2704_v3  ;;  %v197_v11 = vadd.f32 %v134_v9, %v71_v8  ;;  %v272_v9 = vld [vmem:[%s4307_s2 + $0x188] sm:$0xff] }
  0x68   :  { %v323_v15 = vadd.f32 %v260_v12, %v197_v11  ;;  %v147_v11 = vld [vmem:[%s4306_s1 + $0x190] sm:$0xff] }
  0x69   :  { %2375 = vmatmul.mubr.msk.f32.gmra.mrb[48].mxu0 %vm359_vm1, %v310_v13  ;;  %v72_v13 = vld [vmem:[%s4305_s0 + $0x130] sm:$0xff] }
  0x6a   :  { %2377 = vmatprep.mubr.msk.f32.mxu0 %vm2703_vm0, %v2704_v3  ;;  %v198_v16 = vadd.f32 %v135_v14, %v72_v13  ;;  %v273_v14 = vld [vmem:[%s4307_s2 + $0x190] sm:$0xff] }
  0x6c   :  { %v324_v20 = vadd.f32 %v261_v17, %v198_v16  ;;  %v148_v16 = vld [vmem:[%s4306_s1 + $0x198] sm:$0xff] }
  0x6d   :  { %2378 = vmatmul.mubr.msk.f32.gmra.mrb[50].mxu0 %vm359_vm1, %v311_v18  ;;  %v73_v18 = vld [vmem:[%s4305_s0 + $0x138] sm:$0xff] }
  0x6e   :  { %2380 = vmatprep.mubr.msk.f32.mxu0 %vm2703_vm0, %v2704_v3  ;;  %v199_v21 = vadd.f32 %v136_v19, %v73_v18  ;;  %v274_v19 = vld [vmem:[%s4307_s2 + $0x198] sm:$0xff] }
  0x70   :  { %v325_v25 = vadd.f32 %v262_v22, %v199_v21  ;;  %v149_v21 = vld [vmem:[%s4306_s1 + $0x1a0] sm:$0xff] }
  0x71   :  { %2381 = vmatmul.mubr.msk.f32.gmra.mrb[52].mxu0 %vm359_vm1, %v312_v23  ;;  %v74_v23 = vld [vmem:[%s4305_s0 + $0x140] sm:$0xff] }
  0x72   :  { %2383 = vmatprep.mubr.msk.f32.mxu0 %vm2703_vm0, %v2704_v3  ;;  %v200_v26 = vadd.f32 %v137_v24, %v74_v23  ;;  %v275_v24 = vld [vmem:[%s4307_s2 + $0x1a0] sm:$0xff] }
  0x74   :  { %v326_v30 = vadd.f32 %v263_v27, %v200_v26  ;;  %v150_v26 = vld [vmem:[%s4306_s1 + $0x1a8] sm:$0xff] }
  0x75   :  { %2384 = vmatmul.mubr.msk.f32.gmra.mrb[54].mxu0 %vm359_vm1, %v313_v28  ;;  %v75_v28 = vld [vmem:[%s4305_s0 + $0x148] sm:$0xff] }
  0x76   :  { %2386 = vmatprep.mubr.msk.f32.mxu0 %vm2703_vm0, %v2704_v3  ;;  %v201_v31 = vadd.f32 %v138_v29, %v75_v28  ;;  %v276_v29 = vld [vmem:[%s4307_s2 + $0x1a8] sm:$0xff] }
  0x78   :  { %v327_v35 = vadd.f32 %v264_v32, %v201_v31  ;;  %v151_v31 = vld [vmem:[%s4306_s1 + $0x1b0] sm:$0xff]  ;;  %v3436_v32 = vld [vmem:[%s4309_s4] ss:$0 sm:$0xff] }
  0x79   :  { %2387 = vmatmul.mubr.msk.f32.gmra.mrb[56].mxu0 %vm359_vm1, %v314_v33  ;;  %v76_v33 = vld [vmem:[%s4305_s0 + $0x150] sm:$0xff] }
  0x7a   :  { %2389 = vmatprep.mubr.msk.f32.mxu0 %vm2703_vm0, %v2704_v3  ;;  %v202_v36 = vadd.f32 %v139_v34, %v76_v33 }
  0x7c   :  { %v328_v40 = vadd.f32 %v265_v37, %v202_v36  ;;  %v89_v36 = vld [vmem:[%s4305_s0 + $0x1b8] sm:$0xff] }
  0x7d   :  { %2390 = vmatmul.mubr.msk.f32.gmra.mrb[58].mxu0 %vm359_vm1, %v315_v38  ;;  %v77_v38 = vld [vmem:[%s4305_s0 + $0x158] sm:$0xff] }
  0x7e   :  { %2392 = vmatprep.mubr.msk.f32.mxu0 %vm2703_vm0, %v2704_v3  ;;  %v203_v41 = vadd.f32 %v140_v39, %v77_v38  ;;  %v152_v37 = vld [vmem:[%s4306_s1 + $0x1b8] sm:$0xff] }
  0x80   :  { %v329_v45 = vadd.f32 %v266_v42, %v203_v41  ;;  %v215_v42 = vadd.f32 %v152_v37, %v89_v36  ;;  %v96_v36 = vld [vmem:[%s4305_s0 + $0x1f0] sm:$0xff] }
  0x81   :  { %2393 = vmatmul.mubr.msk.f32.gmra.mrb[60].mxu0 %vm359_vm1, %v316_v43  ;;  %v78_v43 = vld [vmem:[%s4305_s0 + $0x160] sm:$0xff]  ;;  %v159_v37 = vld [vmem:[%s4306_s1 + $0x1f0] sm:$0xff] }
  0x82   :  { %2395 = vmatprep.mubr.msk.f32.mxu0 %vm2703_vm0, %v2704_v3  ;;  %v204_v46 = vadd.f32 %v141_v44, %v78_v43  ;;  %v278_v43 = vld [vmem:[%s4307_s2 + $0x1b8] sm:$0xff]  ;;  %v90_v44 = vld [vmem:[%s4305_s0 + $0x1c0] sm:$0xff] }
  0x84   :  { %v330_v50 = vadd.f32 %v267_v47, %v204_v46 }
  0x85   :  { %2396 = vmatmul.mubr.msk.f32.gmra.mrb[62].mxu0 %vm359_vm1, %v317_v48  ;;  %v79_v48 = vld [vmem:[%s4305_s0 + $0x168] sm:$0xff] }
  0x86   :  { %2398 = vmatprep.mubr.msk.f32.mxu0 %vm2703_vm0, %v2704_v3  ;;  %v205_v51 = vadd.f32 %v142_v49, %v79_v48 }
  0x88   :  { %v331_v55 = vadd.f32 %v268_v52, %v205_v51  ;;  %v279_v52 = vld [vmem:[%s4307_s2 + $0x1c0] sm:$0xff] }
  0x89   :  { %2399 = vmatmul.mubr.msk.f32.gmra.mrb[64].mxu0 %vm359_vm1, %v318_v53  ;;  %v80_v53 = vld [vmem:[%s4305_s0 + $0x170] sm:$0xff] }
  0x8a   :  { %2401 = vmatprep.mubr.msk.f32.mxu0 %vm2703_vm0, %v2704_v3  ;;  %v206_v56 = vadd.f32 %v143_v54, %v80_v53  ;;  %v91_v53 = vld [vmem:[%s4305_s0 + $0x1c8] sm:$0xff] }
  0x8b   :  { %v154_v54 = vld [vmem:[%s4306_s1 + $0x1c8] sm:$0xff] }
  0x8c   :  { %v332_v60 = vadd.f32 %v269_v57, %v206_v56 }
  0x8d   :  { %2402 = vmatmul.mubr.msk.f32.gmra.mrb[66].mxu0 %vm359_vm1, %v319_v58  ;;  %v81_v58 = vld [vmem:[%s4305_s0 + $0x178] sm:$0xff] }
  0x8e   :  { %2404 = vmatprep.mubr.msk.f32.mxu0 %vm2703_vm0, %v2704_v3  ;;  %v207_v61 = vadd.f32 %v144_v59, %v81_v58 }
  0x90   :  { %v333_v2 = vadd.f32 %v270_v62, %v207_v61  ;;  %v280_v61 = vld [vmem:[%s4307_s2 + $0x1c8] sm:$0xff]  ;;  %v92_v62 = vld [vmem:[%s4305_s0 + $0x1d0] sm:$0xff] }
  0x91   :  { %2405 = vmatmul.mubr.msk.f32.gmra.mrb[68].mxu0 %vm359_vm1, %v320_v63  ;;  %v82_v63 = vld [vmem:[%s4305_s0 + $0x180] sm:$0xff] }
  0x92   :  { %2407 = vmatprep.mubr.msk.f32.mxu0 %vm2703_vm0, %v2704_v3  ;;  %v208_v4 = vadd.f32 %v145_v1, %v82_v63  ;;  %v155_v63 = vld [vmem:[%s4306_s1 + $0x1d0] sm:$0xff] }
  0x94   :  { %v334_v7 = vadd.f32 %v271_v5, %v208_v4 }
  0x95   :  { %2408 = vmatmul.mubr.msk.f32.gmra.mrb[70].mxu0 %vm359_vm1, %v321_v0  ;;  %v83_v0 = vld [vmem:[%s4305_s0 + $0x188] sm:$0xff] }
  0x96   :  { %2410 = vmatprep.mubr.msk.f32.mxu0 %vm2703_vm0, %v2704_v3  ;;  %v209_v8 = vadd.f32 %v146_v6, %v83_v0  ;;  %v218_v6 = vadd.f32 %v155_v63, %v92_v62 }
  0x98   :  { %v335_v12 = vadd.f32 %v272_v9, %v209_v8  ;;  %v93_v8 = vld [vmem:[%s4305_s0 + $0x1d8] sm:$0xff] }
  0x99   :  { %2411 = vmatmul.mubr.msk.f32.gmra.mrb[72].mxu0 %vm359_vm1, %v322_v10  ;;  %v84_v10 = vld [vmem:[%s4305_s0 + $0x190] sm:$0xff]  ;;  %v156_v9 = vld [vmem:[%s4306_s1 + $0x1d8] sm:$0xff] }
  0x9a   :  { %2413 = vmatprep.mubr.msk.f32.mxu0 %vm2703_vm0, %v2704_v3  ;;  %v210_v13 = vadd.f32 %v147_v11, %v84_v10 }
  0x9c   :  { %v336_v17 = vadd.f32 %v273_v14, %v210_v13 }
  0x9d   :  { %2414 = vmatmul.mubr.msk.f32.gmra.mrb[74].mxu0 %vm359_vm1, %v323_v15  ;;  %v85_v15 = vld [vmem:[%s4305_s0 + $0x198] sm:$0xff] }
  0x9e   :  { %2416 = vmatprep.mubr.msk.f32.mxu0 %vm2703_vm0, %v2704_v3  ;;  %v211_v18 = vadd.f32 %v148_v16, %v85_v15  ;;  %v219_v15 = vadd.f32 %v156_v9, %v93_v8  ;;  %v282_v16 = vld [vmem:[%s4307_s2 + $0x1d8] sm:$0xff] }
  0xa0   :  { %v337_v22 = vadd.f32 %v274_v19, %v211_v18  ;;  %v157_v18 = vld [vmem:[%s4306_s1 + $0x1e0] sm:$0xff] }
  0xa1   :  { %2417 = vmatmul.mubr.msk.f32.gmra.mrb[76].mxu0 %vm359_vm1, %v324_v20  ;;  %v86_v20 = vld [vmem:[%s4305_s0 + $0x1a0] sm:$0xff] }
  0xa2   :  { %2419 = vmatprep.mubr.msk.f32.mxu0 %vm2703_vm0, %v2704_v3  ;;  %v212_v23 = vadd.f32 %v149_v21, %v86_v20 }
  0xa4   :  { %v338_v27 = vadd.f32 %v275_v24, %v212_v23  ;;  %v345_v23 = vadd.f32 %v282_v16, %v219_v15 }
  0xa5   :  { %2420 = vmatmul.mubr.msk.f32.gmra.mrb[78].mxu0 %vm359_vm1, %v325_v25  ;;  %v87_v25 = vld [vmem:[%s4305_s0 + $0x1a8] sm:$0xff] }
  0xa6   :  { %2422 = vmatprep.mubr.msk.f32.mxu0 %vm2703_vm0, %v2704_v3  ;;  %v213_v28 = vadd.f32 %v150_v26, %v87_v25  ;;  %v283_v25 = vld [vmem:[%s4307_s2 + $0x1e0] sm:$0xff]  ;;  %v95_v26 = vld [vmem:[%s4305_s0 + $0x1e8] sm:$0xff] }
  0xa8   :  { %v339_v33 = vadd.f32 %v276_v29, %v213_v28 }
  0xa9   :  { %2423 = vmatmul.mubr.msk.f32.gmra.mrb[80].mxu0 %vm359_vm1, %v326_v30  ;;  %v88_v30 = vld [vmem:[%s4305_s0 + $0x1b0] sm:$0xff] }
  0xaa   :  { %2425 = vmatprep.mubr.msk.f32.mxu0 %vm2703_vm0, %v2704_v3  ;;  %v214_v34 = vadd.f32 %v151_v31, %v88_v30 }
  0xad   :  { %2426 = vmatmul.mubr.msk.f32.gmra.mrb[82].mxu0 %vm359_vm1, %v327_v35  ;;  %v277_v35 = vld [vmem:[%s4307_s2 + $0x1b0] sm:$0xff] }
  0xae   :  { %2428 = vmatprep.mubr.msk.f32.mxu0 %vm2703_vm0, %v2704_v3  ;;  %v340_v41 = vadd.f32 %v277_v35, %v214_v34  ;;  %v284_v35 = vld [vmem:[%s4307_s2 + $0x1e8] sm:$0xff] }
  0xb1   :  { %2429 = vmatmul.mubr.msk.f32.gmra.mrb[84].mxu0 %vm359_vm1, %v328_v40 }
  0xb2   :  { %2431 = vmatprep.mubr.msk.f32.mxu0 %vm2703_vm0, %v2704_v3 }
  0xb5   :  { %2432 = vmatmul.mubr.msk.f32.gmra.mrb[86].mxu0 %vm359_vm1, %v329_v45  ;;  %v153_v45 = vld [vmem:[%s4306_s1 + $0x1c0] sm:$0xff] }
  0xb6   :  { %2434 = vmatprep.mubr.msk.f32.mxu0 %vm2703_vm0, %v2704_v3  ;;  %v216_v51 = vadd.f32 %v153_v45, %v90_v44  ;;  %v285_v44 = vld [vmem:[%s4307_s2 + $0x1f0] sm:$0xff] }
  0xb8   :  { %v342_v59 = vadd.f32 %v279_v52, %v216_v51 }
  0xb9   :  { %2435 = vmatmul.mubr.msk.f32.gmra.mrb[88].mxu0 %vm359_vm1, %v330_v50  ;;  %v341_v50 = vadd.f32 %v278_v43, %v215_v42  ;;  %v222_v43 = vadd.f32 %v159_v37, %v96_v36 }
  0xba   :  { %2437 = vmatprep.mubr.msk.f32.mxu0 %vm2703_vm0, %v2704_v3 }
  0xbd   :  { %2438 = vmatmul.mubr.msk.f32.gmra.mrb[90].mxu0 %vm359_vm1, %v331_v55 }
  0xbe   :  { %2440 = vmatprep.mubr.msk.f32.mxu0 %vm2703_vm0, %v2704_v3 }
  0xc1   :  { %2441 = vmatmul.mubr.msk.f32.gmra.mrb[92].mxu0 %vm359_vm1, %v332_v60  ;;  %v217_v60 = vadd.f32 %v154_v54, %v91_v53 }
  0xc2   :  { %2443 = vmatprep.mubr.msk.f32.mxu0 %vm2703_vm0, %v2704_v3 }
  0xc3   :  { %v343_v0 = vadd.f32 %v280_v61, %v217_v60 }
  0xc5   :  { %2444 = vmatmul.mubr.msk.f32.gmra.mrb[94].mxu0 %vm359_vm1, %v333_v2 }
  0xc6   :  { %2446 = vmatprep.mubr.msk.f32.mxu0 %vm2703_vm0, %v2704_v3 }
  0xc9   :  { %2447 = vmatmul.mubr.msk.f32.gmra.mrb[96].mxu0 %vm359_vm1, %v334_v7  ;;  %v281_v7 = vld [vmem:[%s4307_s2 + $0x1d0] sm:$0xff] }
  0xca   :  { %2449 = vmatprep.mubr.msk.f32.mxu0 %vm2703_vm0, %v2704_v3  ;;  %v344_v14 = vadd.f32 %v281_v7, %v218_v6 }
  0xcd   :  { %2450 = vmatmul.mubr.msk.f32.gmra.mrb[98].mxu0 %vm359_vm1, %v335_v12 }
  0xce   :  { %2452 = vmatprep.mubr.msk.f32.mxu0 %vm2703_vm0, %v2704_v3 }
  0xd1   :  { %2453 = vmatmul.mubr.msk.f32.gmra.mrb[100].mxu0 %vm359_vm1, %v336_v17  ;;  %v94_v17 = vld [vmem:[%s4305_s0 + $0x1e0] sm:$0xff] }
  0xd2   :  { %2455 = vmatprep.mubr.msk.f32.mxu0 %vm2703_vm0, %v2704_v3  ;;  %v220_v24 = vadd.f32 %v157_v18, %v94_v17 }
  0xd5   :  { %2456 = vmatmul.mubr.msk.f32.gmra.mrb[102].mxu0 %vm359_vm1, %v337_v22 }
  0xd6   :  { %2458 = vmatprep.mubr.msk.f32.mxu0 %vm2703_vm0, %v2704_v3 }
  0xd9   :  { %2459 = vmatmul.mubr.msk.f32.gmra.mrb[104].mxu0 %vm359_vm1, %v338_v27  ;;  %v158_v27 = vld [vmem:[%s4306_s1 + $0x1e8] sm:$0xff] }
  0xda   :  { %2461 = vmatprep.mubr.msk.f32.mxu0 %vm2703_vm0, %v2704_v3  ;;  %v221_v34 = vadd.f32 %v158_v27, %v95_v26 }
  0xdc   :  { %v615_v38 = vpop.f32.mrb[0].mxu0  ;;  %v347_v42 = vadd.f32 %v284_v35, %v221_v34 }
  0xdd   :  { %v616_v39 = vadd.f32 %v3436_v32, %v615_v38  ;;  %v2304_v40 = vpop.f32.mrb[1].mxu0  ;;  %2462 = vmatmul.mubr.msk.f32.gmra.mrb[106].mxu0 %vm359_vm1, %v339_v33  ;;  %v346_v33 = vadd.f32 %v283_v25, %v220_v24 }
  0xde   :  { %2464 = vmatprep.mubr.msk.f32.mxu0 %vm2703_vm0, %v2704_v3 }
  0xdf   :  { %v929_v46 = vmax.f32 %v616_v39, 0.0 }
  0xe0   :  { %v620_v47 = vpop.f32.mrb[2].mxu0 }
  0xe1   :  { %v621_v48 = vadd.f32 %v3436_v32, %v620_v47  ;;  %v2307_v49 = vpop.f32.mrb[3].mxu0  ;;  %2465 = vmatmul.mubr.msk.f32.gmra.mrb[108].mxu0 %vm359_vm1, %v340_v41  ;;  %2500 = vmatmul.mubr.msk.f32.vlgmr.msra.gmra.mrb[0].mxu1 %vm1003_vm2, %v929_v46 }
  0xe2   :  { %2467 = vmatprep.mubr.msk.f32.mxu0 %vm2703_vm0, %v2704_v3  ;;  %2502 = vmatprep.mubr.msk.f32.mxu1 %vm2703_vm0, %v2704_v3  ;;  %v348_v49 = vadd.f32 %v285_v44, %v222_v43 }
  0xe3   :  { %v930_v55 = vmax.f32 %v621_v48, 0.0 }
  0xe4   :  { %v625_v56 = vpop.f32.mrb[4].mxu0 }
  0xe5   :  { %v626_v57 = vadd.f32 %v3436_v32, %v625_v56  ;;  %v2310_v58 = vpop.f32.mrb[5].mxu0  ;;  %2468 = vmatmul.mubr.msk.f32.gmra.mrb[110].mxu0 %vm359_vm1, %v341_v50  ;;  %2503 = vmatmul.mubr.msk.f32.gmra.mrb[2].mxu1 %vm1003_vm2, %v930_v55 }
  0xe6   :  { %2470 = vmatprep.mubr.msk.f32.mxu0 %vm2703_vm0, %v2704_v3  ;;  %2505 = vmatprep.mubr.msk.f32.mxu1 %vm2703_vm0, %v2704_v3 }
  0xe7   :  { %v931_v1 = vmax.f32 %v626_v57, 0.0 }
  0xe8   :  { %v630_v2 = vpop.f32.mrb[6].mxu0 }
  0xe9   :  { %v631_v4 = vadd.f32 %v3436_v32, %v630_v2  ;;  %v2313_v5 = vpop.f32.mrb[7].mxu0  ;;  %2471 = vmatmul.mubr.msk.f32.gmra.mrb[112].mxu0 %vm359_vm1, %v342_v59  ;;  %2506 = vmatmul.mubr.msk.f32.gmra.mrb[4].mxu1 %vm1003_vm2, %v931_v1 }
  0xea   :  { %2473 = vmatprep.mubr.msk.f32.mxu0 %vm2703_vm0, %v2704_v3  ;;  %2508 = vmatprep.mubr.msk.f32.mxu1 %vm2703_vm0, %v2704_v3 }
  0xeb   :  { %v932_v10 = vmax.f32 %v631_v4, 0.0 }
  0xec   :  { %v635_v11 = vpop.f32.mrb[8].mxu0 }
  0xed   :  { %v636_v12 = vadd.f32 %v3436_v32, %v635_v11  ;;  %v2316_v13 = vpop.f32.mrb[9].mxu0  ;;  %2474 = vmatmul.mubr.msk.f32.gmra.mrb[114].mxu0 %vm359_vm1, %v343_v0  ;;  %2509 = vmatmul.mubr.msk.f32.gmra.mrb[6].mxu1 %vm1003_vm2, %v932_v10 }
  0xee   :  { %2476 = vmatprep.mubr.msk.f32.mxu0 %vm2703_vm0, %v2704_v3  ;;  %2511 = vmatprep.mubr.msk.f32.mxu1 %vm2703_vm0, %v2704_v3 }
  0xef   :  { %v933_v19 = vmax.f32 %v636_v12, 0.0 }
  0xf0   :  { %v640_v20 = vpop.f32.mrb[10].mxu0 }
  0xf1   :  { %v641_v21 = vadd.f32 %v3436_v32, %v640_v20  ;;  %v2319_v22 = vpop.f32.mrb[11].mxu0  ;;  %2477 = vmatmul.mubr.msk.f32.gmra.mrb[116].mxu0 %vm359_vm1, %v344_v14  ;;  %2512 = vmatmul.mubr.msk.f32.gmra.mrb[8].mxu1 %vm1003_vm2, %v933_v19 }
  0xf2   :  { %2479 = vmatprep.mubr.msk.f32.mxu0 %vm2703_vm0, %v2704_v3  ;;  %2514 = vmatprep.mubr.msk.f32.mxu1 %vm2703_vm0, %v2704_v3 }
  0xf3   :  { %v934_v28 = vmax.f32 %v641_v21, 0.0 }
  0xf4   :  { %v645_v29 = vpop.f32.mrb[12].mxu0 }
  0xf5   :  { %v646_v30 = vadd.f32 %v3436_v32, %v645_v29  ;;  %v2322_v31 = vpop.f32.mrb[13].mxu0  ;;  %2480 = vmatmul.mubr.msk.f32.gmra.mrb[118].mxu0 %vm359_vm1, %v345_v23  ;;  %2515 = vmatmul.mubr.msk.f32.gmra.mrb[10].mxu1 %vm1003_vm2, %v934_v28 }
  0xf6   :  { %2482 = vmatprep.mubr.msk.f32.mxu0 %vm2703_vm0, %v2704_v3  ;;  %2517 = vmatprep.mubr.msk.f32.mxu1 %vm2703_vm0, %v2704_v3 }
  0xf7   :  { %v935_v38 = vmax.f32 %v646_v30, 0.0 }
  0xf8   :  { %v650_v39 = vpop.f32.mrb[14].mxu0 }
  0xf9   :  { %v651_v40 = vadd.f32 %v3436_v32, %v650_v39  ;;  %v2325_v41 = vpop.f32.mrb[15].mxu0  ;;  %2483 = vmatmul.mubr.msk.f32.gmra.mrb[120].mxu0 %vm359_vm1, %v346_v33  ;;  %2518 = vmatmul.mubr.msk.f32.gmra.mrb[12].mxu1 %vm1003_vm2, %v935_v38 }
  0xfa   :  { %2485 = vmatprep.mubr.msk.f32.mxu0 %vm2703_vm0, %v2704_v3  ;;  %2520 = vmatprep.mubr.msk.f32.mxu1 %vm2703_vm0, %v2704_v3 }
  0xfb   :  { %v936_v45 = vmax.f32 %v651_v40, 0.0 }
  0xfc   :  { %v655_v46 = vpop.f32.mrb[16].mxu0 }
  0xfd   :  { %v656_v47 = vadd.f32 %v3436_v32, %v655_v46  ;;  %v2328_v48 = vpop.f32.mrb[17].mxu0  ;;  %2486 = vmatmul.mubr.msk.f32.gmra.mrb[122].mxu0 %vm359_vm1, %v347_v42  ;;  %2521 = vmatmul.mubr.msk.f32.gmra.mrb[14].mxu1 %vm1003_vm2, %v936_v45 }
  0xfe   :  { %2488 = vmatprep.mubr.msk.f32.mxu0 %vm2703_vm0, %v2704_v3  ;;  %2523 = vmatprep.mubr.msk.f32.mxu1 %vm2703_vm0, %v2704_v3 }
  0xff   :  { %v937_v50 = vmax.f32 %v656_v47, 0.0 }
 0x100   :  { %v660_v51 = vpop.f32.mrb[18].mxu0 }
 0x101   :  { %v661_v52 = vadd.f32 %v3436_v32, %v660_v51  ;;  %v2331_v53 = vpop.f32.mrb[19].mxu0  ;;  %2489 = vmatmul.mubr.msk.f32.gmra.mrb[124].mxu0 %vm359_vm1, %v348_v49  ;;  %2524 = vmatmul.mubr.msk.f32.gmra.mrb[16].mxu1 %vm1003_vm2, %v937_v50 }
 0x102   :  { %2526 = vmatprep.mubr.msk.f32.mxu1 %vm2703_vm0, %v2704_v3 }
 0x103   :  { %v938_v54 = vmax.f32 %v661_v52, 0.0 }
 0x104   :  { %v665_v55 = vpop.f32.mrb[20].mxu0 }
 0x105   :  { %v666_v56 = vadd.f32 %v3436_v32, %v665_v55  ;;  %v2334_v57 = vpop.f32.mrb[21].mxu0  ;;  %2527 = vmatmul.mubr.msk.f32.gmra.mrb[18].mxu1 %vm1003_vm2, %v938_v54 }
 0x106   :  { %2529 = vmatprep.mubr.msk.f32.mxu1 %vm2703_vm0, %v2704_v3 }
 0x107   :  { %v939_v58 = vmax.f32 %v666_v56, 0.0 }
 0x108   :  { %v670_v59 = vpop.f32.mrb[22].mxu0 }
 0x109   :  { %v671_v60 = vadd.f32 %v3436_v32, %v670_v59  ;;  %v2337_v61 = vpop.f32.mrb[23].mxu0  ;;  %2530 = vmatmul.mubr.msk.f32.gmra.mrb[20].mxu1 %vm1003_vm2, %v939_v58 }
 0x10a   :  { %2532 = vmatprep.mubr.msk.f32.mxu1 %vm2703_vm0, %v2704_v3 }
 0x10b   :  { %v940_v62 = vmax.f32 %v671_v60, 0.0 }
 0x10c   :  { %v675_v63 = vpop.f32.mrb[24].mxu0 }
 0x10d   :  { %v676_v1 = vadd.f32 %v3436_v32, %v675_v63  ;;  %v2340_v2 = vpop.f32.mrb[25].mxu0  ;;  %2533 = vmatmul.mubr.msk.f32.gmra.mrb[22].mxu1 %vm1003_vm2, %v940_v62 }
 0x10e   :  { %2535 = vmatprep.mubr.msk.f32.mxu1 %vm2703_vm0, %v2704_v3 }
 0x10f   :  { %v941_v4 = vmax.f32 %v676_v1, 0.0 }
 0x110   :  { %v680_v5 = vpop.f32.mrb[26].mxu0 }
 0x111   :  { %v681_v0 = vadd.f32 %v3436_v32, %v680_v5  ;;  %v2343_v6 = vpop.f32.mrb[27].mxu0  ;;  %2536 = vmatmul.mubr.msk.f32.gmra.mrb[24].mxu1 %vm1003_vm2, %v941_v4 }
 0x112   :  { %2538 = vmatprep.mubr.msk.f32.mxu1 %vm2703_vm0, %v2704_v3 }
 0x113   :  { %v942_v7 = vmax.f32 %v681_v0, 0.0 }
 0x114   :  { %v685_v8 = vpop.f32.mrb[28].mxu0 }
 0x115   :  { %v686_v9 = vadd.f32 %v3436_v32, %v685_v8  ;;  %v2346_v10 = vpop.f32.mrb[29].mxu0  ;;  %2539 = vmatmul.mubr.msk.f32.gmra.mrb[26].mxu1 %vm1003_vm2, %v942_v7 }
 0x116   :  { %2541 = vmatprep.mubr.msk.f32.mxu1 %vm2703_vm0, %v2704_v3 }
 0x117   :  { %v943_v11 = vmax.f32 %v686_v9, 0.0 }
 0x118   :  { %v690_v12 = vpop.f32.mrb[30].mxu0 }
 0x119   :  { %v691_v13 = vadd.f32 %v3436_v32, %v690_v12  ;;  %v2349_v14 = vpop.f32.mrb[31].mxu0  ;;  %2542 = vmatmul.mubr.msk.f32.gmra.mrb[28].mxu1 %vm1003_vm2, %v943_v11 }
 0x11a   :  { %2544 = vmatprep.mubr.msk.f32.mxu1 %vm2703_vm0, %v2704_v3 }
 0x11b   :  { %v944_v15 = vmax.f32 %v691_v13, 0.0 }
 0x11c   :  { %v695_v16 = vpop.f32.mrb[32].mxu0 }
 0x11d   :  { %v696_v17 = vadd.f32 %v3436_v32, %v695_v16  ;;  %v2352_v18 = vpop.f32.mrb[33].mxu0  ;;  %2545 = vmatmul.mubr.msk.f32.gmra.mrb[30].mxu1 %vm1003_vm2, %v944_v15 }
 0x11e   :  { %2547 = vmatprep.mubr.msk.f32.mxu1 %vm2703_vm0, %v2704_v3 }
 0x11f   :  { %v945_v19 = vmax.f32 %v696_v17, 0.0 }
 0x120   :  { %v700_v20 = vpop.f32.mrb[34].mxu0 }
 0x121   :  { %v701_v21 = vadd.f32 %v3436_v32, %v700_v20  ;;  %v2355_v22 = vpop.f32.mrb[35].mxu0  ;;  %2548 = vmatmul.mubr.msk.f32.gmra.mrb[32].mxu1 %vm1003_vm2, %v945_v19 }
 0x122   :  { %2550 = vmatprep.mubr.msk.f32.mxu1 %vm2703_vm0, %v2704_v3 }
 0x123   :  { %v946_v23 = vmax.f32 %v701_v21, 0.0 }
 0x124   :  { %v705_v24 = vpop.f32.mrb[36].mxu0 }
 0x125   :  { %v706_v25 = vadd.f32 %v3436_v32, %v705_v24  ;;  %v2358_v26 = vpop.f32.mrb[37].mxu0  ;;  %2551 = vmatmul.mubr.msk.f32.gmra.mrb[34].mxu1 %vm1003_vm2, %v946_v23 }
 0x126   :  { %2553 = vmatprep.mubr.msk.f32.mxu1 %vm2703_vm0, %v2704_v3 }
 0x127   :  { %v947_v27 = vmax.f32 %v706_v25, 0.0 }
 0x128   :  { %v710_v28 = vpop.f32.mrb[38].mxu0 }
 0x129   :  { %v711_v29 = vadd.f32 %v3436_v32, %v710_v28  ;;  %v2361_v30 = vpop.f32.mrb[39].mxu0  ;;  %2554 = vmatmul.mubr.msk.f32.gmra.mrb[36].mxu1 %vm1003_vm2, %v947_v27 }
 0x12a   :  { %2556 = vmatprep.mubr.msk.f32.mxu1 %vm2703_vm0, %v2704_v3 }
 0x12b   :  { %v948_v31 = vmax.f32 %v711_v29, 0.0 }
 0x12c   :  { %v715_v33 = vpop.f32.mrb[40].mxu0 }
 0x12d   :  { %v716_v34 = vadd.f32 %v3436_v32, %v715_v33  ;;  %v2364_v35 = vpop.f32.mrb[41].mxu0  ;;  %2557 = vmatmul.mubr.msk.f32.gmra.mrb[38].mxu1 %vm1003_vm2, %v948_v31 }
 0x12e   :  { %2559 = vmatprep.mubr.msk.f32.mxu1 %vm2703_vm0, %v2704_v3 }
 0x12f   :  { %v949_v36 = vmax.f32 %v716_v34, 0.0 }
 0x130   :  { %v720_v37 = vpop.f32.mrb[42].mxu0 }
 0x131   :  { %v721_v38 = vadd.f32 %v3436_v32, %v720_v37  ;;  %v2367_v39 = vpop.f32.mrb[43].mxu0  ;;  %2560 = vmatmul.mubr.msk.f32.gmra.mrb[40].mxu1 %vm1003_vm2, %v949_v36 }
 0x132   :  { %2562 = vmatprep.mubr.msk.f32.mxu1 %vm2703_vm0, %v2704_v3 }
 0x133   :  { %v950_v40 = vmax.f32 %v721_v38, 0.0 }
 0x134   :  { %v725_v41 = vpop.f32.mrb[44].mxu0 }
 0x135   :  { %v726_v42 = vadd.f32 %v3436_v32, %v725_v41  ;;  %v2370_v43 = vpop.f32.mrb[45].mxu0  ;;  %2563 = vmatmul.mubr.msk.f32.gmra.mrb[42].mxu1 %vm1003_vm2, %v950_v40 }
 0x136   :  { %2565 = vmatprep.mubr.msk.f32.mxu1 %vm2703_vm0, %v2704_v3 }
 0x137   :  { %v951_v44 = vmax.f32 %v726_v42, 0.0 }
 0x138   :  { %v730_v45 = vpop.f32.mrb[46].mxu0 }
 0x139   :  { %v731_v46 = vadd.f32 %v3436_v32, %v730_v45  ;;  %v2373_v47 = vpop.f32.mrb[47].mxu0  ;;  %2566 = vmatmul.mubr.msk.f32.gmra.mrb[44].mxu1 %vm1003_vm2, %v951_v44 }
 0x13a   :  { %2568 = vmatprep.mubr.msk.f32.mxu1 %vm2703_vm0, %v2704_v3 }
 0x13b   :  { %v952_v48 = vmax.f32 %v731_v46, 0.0 }
 0x13c   :  { %v735_v49 = vpop.f32.mrb[48].mxu0 }
 0x13d   :  { %v736_v50 = vadd.f32 %v3436_v32, %v735_v49  ;;  %v2376_v51 = vpop.f32.mrb[49].mxu0  ;;  %2569 = vmatmul.mubr.msk.f32.gmra.mrb[46].mxu1 %vm1003_vm2, %v952_v48 }
 0x13e   :  { %2571 = vmatprep.mubr.msk.f32.mxu1 %vm2703_vm0, %v2704_v3 }
 0x13f   :  { %v953_v52 = vmax.f32 %v736_v50, 0.0 }
 0x140   :  { %v740_v53 = vpop.f32.mrb[50].mxu0 }
 0x141   :  { %v741_v54 = vadd.f32 %v3436_v32, %v740_v53  ;;  %v2379_v55 = vpop.f32.mrb[51].mxu0  ;;  %2572 = vmatmul.mubr.msk.f32.gmra.mrb[48].mxu1 %vm1003_vm2, %v953_v52 }
 0x142   :  { %2574 = vmatprep.mubr.msk.f32.mxu1 %vm2703_vm0, %v2704_v3 }
 0x143   :  { %v954_v56 = vmax.f32 %v741_v54, 0.0 }
 0x144   :  { %v745_v57 = vpop.f32.mrb[52].mxu0 }
 0x145   :  { %v746_v58 = vadd.f32 %v3436_v32, %v745_v57  ;;  %v2382_v59 = vpop.f32.mrb[53].mxu0  ;;  %2575 = vmatmul.mubr.msk.f32.gmra.mrb[50].mxu1 %vm1003_vm2, %v954_v56 }
 0x146   :  { %2577 = vmatprep.mubr.msk.f32.mxu1 %vm2703_vm0, %v2704_v3 }
 0x147   :  { %v955_v60 = vmax.f32 %v746_v58, 0.0 }
 0x148   :  { %v750_v61 = vpop.f32.mrb[54].mxu0 }
 0x149   :  { %v751_v62 = vadd.f32 %v3436_v32, %v750_v61  ;;  %v2385_v63 = vpop.f32.mrb[55].mxu0  ;;  %2578 = vmatmul.mubr.msk.f32.gmra.mrb[52].mxu1 %vm1003_vm2, %v955_v60 }
 0x14a   :  { %2580 = vmatprep.mubr.msk.f32.mxu1 %vm2703_vm0, %v2704_v3 }
 0x14b   :  { %v956_v1 = vmax.f32 %v751_v62, 0.0 }
 0x14c   :  { %v755_v2 = vpop.f32.mrb[56].mxu0 }
 0x14d   :  { %v756_v4 = vadd.f32 %v3436_v32, %v755_v2  ;;  %v2388_v5 = vpop.f32.mrb[57].mxu0  ;;  %2581 = vmatmul.mubr.msk.f32.gmra.mrb[54].mxu1 %vm1003_vm2, %v956_v1 }
 0x14e   :  { %2583 = vmatprep.mubr.msk.f32.mxu1 %vm2703_vm0, %v2704_v3 }
 0x14f   :  { %v957_v0 = vmax.f32 %v756_v4, 0.0 }
 0x150   :  { %v760_v6 = vpop.f32.mrb[58].mxu0 }
 0x151   :  { %v761_v7 = vadd.f32 %v3436_v32, %v760_v6  ;;  %v2391_v8 = vpop.f32.mrb[59].mxu0  ;;  %2584 = vmatmul.mubr.msk.f32.gmra.mrb[56].mxu1 %vm1003_vm2, %v957_v0 }
 0x152   :  { %2586 = vmatprep.mubr.msk.f32.mxu1 %vm2703_vm0, %v2704_v3 }
 0x153   :  { %v958_v9 = vmax.f32 %v761_v7, 0.0 }
 0x154   :  { %v765_v10 = vpop.f32.mrb[60].mxu0 }
 0x155   :  { %v766_v11 = vadd.f32 %v3436_v32, %v765_v10  ;;  %v2394_v12 = vpop.f32.mrb[61].mxu0  ;;  %2587 = vmatmul.mubr.msk.f32.gmra.mrb[58].mxu1 %vm1003_vm2, %v958_v9 }
 0x156   :  { %2589 = vmatprep.mubr.msk.f32.mxu1 %vm2703_vm0, %v2704_v3 }
 0x157   :  { %v959_v13 = vmax.f32 %v766_v11, 0.0 }
 0x158   :  { %v770_v14 = vpop.f32.mrb[62].mxu0 }
 0x159   :  { %v771_v15 = vadd.f32 %v3436_v32, %v770_v14  ;;  %v2397_v16 = vpop.f32.mrb[63].mxu0  ;;  %2590 = vmatmul.mubr.msk.f32.gmra.mrb[60].mxu1 %vm1003_vm2, %v959_v13 }
 0x15a   :  { %2592 = vmatprep.mubr.msk.f32.mxu1 %vm2703_vm0, %v2704_v3 }
 0x15b   :  { %v960_v17 = vmax.f32 %v771_v15, 0.0 }
 0x15c   :  { %v775_v18 = vpop.f32.mrb[64].mxu0 }
 0x15d   :  { %v776_v19 = vadd.f32 %v3436_v32, %v775_v18  ;;  %v2400_v20 = vpop.f32.mrb[65].mxu0  ;;  %2593 = vmatmul.mubr.msk.f32.gmra.mrb[62].mxu1 %vm1003_vm2, %v960_v17 }
 0x15e   :  { %2595 = vmatprep.mubr.msk.f32.mxu1 %vm2703_vm0, %v2704_v3 }
 0x15f   :  { %v961_v21 = vmax.f32 %v776_v19, 0.0 }
 0x160   :  { %v780_v22 = vpop.f32.mrb[66].mxu0 }
 0x161   :  { %v781_v23 = vadd.f32 %v3436_v32, %v780_v22  ;;  %v2403_v24 = vpop.f32.mrb[67].mxu0  ;;  %2596 = vmatmul.mubr.msk.f32.gmra.mrb[64].mxu1 %vm1003_vm2, %v961_v21 }
 0x162   :  { %2598 = vmatprep.mubr.msk.f32.mxu1 %vm2703_vm0, %v2704_v3 }
 0x163   :  { %v962_v25 = vmax.f32 %v781_v23, 0.0 }
 0x164   :  { %v785_v26 = vpop.f32.mrb[68].mxu0 }
 0x165   :  { %v786_v27 = vadd.f32 %v3436_v32, %v785_v26  ;;  %v2406_v28 = vpop.f32.mrb[69].mxu0  ;;  %2599 = vmatmul.mubr.msk.f32.gmra.mrb[66].mxu1 %vm1003_vm2, %v962_v25 }
 0x166   :  { %2601 = vmatprep.mubr.msk.f32.mxu1 %vm2703_vm0, %v2704_v3 }
 0x167   :  { %v963_v29 = vmax.f32 %v786_v27, 0.0 }
 0x168   :  { %v790_v30 = vpop.f32.mrb[70].mxu0 }
 0x169   :  { %v791_v31 = vadd.f32 %v3436_v32, %v790_v30  ;;  %v2409_v33 = vpop.f32.mrb[71].mxu0  ;;  %2602 = vmatmul.mubr.msk.f32.gmra.mrb[68].mxu1 %vm1003_vm2, %v963_v29 }
 0x16a   :  { %2604 = vmatprep.mubr.msk.f32.mxu1 %vm2703_vm0, %v2704_v3 }
 0x16b   :  { %v964_v34 = vmax.f32 %v791_v31, 0.0 }
 0x16c   :  { %v795_v35 = vpop.f32.mrb[72].mxu0 }
 0x16d   :  { %v796_v36 = vadd.f32 %v3436_v32, %v795_v35  ;;  %v2412_v37 = vpop.f32.mrb[73].mxu0  ;;  %2605 = vmatmul.mubr.msk.f32.gmra.mrb[70].mxu1 %vm1003_vm2, %v964_v34 }
 0x16e   :  { %2607 = vmatprep.mubr.msk.f32.mxu1 %vm2703_vm0, %v2704_v3 }
 0x16f   :  { %v965_v38 = vmax.f32 %v796_v36, 0.0 }
 0x170   :  { %v800_v39 = vpop.f32.mrb[74].mxu0 }
 0x171   :  { %v801_v40 = vadd.f32 %v3436_v32, %v800_v39  ;;  %v2415_v41 = vpop.f32.mrb[75].mxu0  ;;  %2608 = vmatmul.mubr.msk.f32.gmra.mrb[72].mxu1 %vm1003_vm2, %v965_v38 }
 0x172   :  { %2610 = vmatprep.mubr.msk.f32.mxu1 %vm2703_vm0, %v2704_v3 }
 0x173   :  { %v966_v42 = vmax.f32 %v801_v40, 0.0 }
 0x174   :  { %v805_v43 = vpop.f32.mrb[76].mxu0 }
 0x175   :  { %v806_v44 = vadd.f32 %v3436_v32, %v805_v43  ;;  %v2418_v45 = vpop.f32.mrb[77].mxu0  ;;  %2611 = vmatmul.mubr.msk.f32.gmra.mrb[74].mxu1 %vm1003_vm2, %v966_v42 }
 0x176   :  { %2613 = vmatprep.mubr.msk.f32.mxu1 %vm2703_vm0, %v2704_v3 }
 0x177   :  { %v967_v46 = vmax.f32 %v806_v44, 0.0  ;;  %v3757_v44 = vld [vmem:[%s4310_s6] ss:$0 sm:$0xff] }
 0x178   :  { %v810_v47 = vpop.f32.mrb[78].mxu0 }
 0x179   :  { %v811_v48 = vadd.f32 %v3436_v32, %v810_v47  ;;  %v2421_v49 = vpop.f32.mrb[79].mxu0  ;;  %2614 = vmatmul.mubr.msk.f32.gmra.mrb[76].mxu1 %vm1003_vm2, %v967_v46 }
 0x17a   :  { %2616 = vmatprep.mubr.msk.f32.mxu1 %vm2703_vm0, %v2704_v3 }
 0x17b   :  { %v968_v50 = vmax.f32 %v811_v48, 0.0 }
 0x17c   :  { %v815_v51 = vpop.f32.mrb[80].mxu0 }
 0x17d   :  { %v816_v52 = vadd.f32 %v3436_v32, %v815_v51  ;;  %v2424_v53 = vpop.f32.mrb[81].mxu0  ;;  %2617 = vmatmul.mubr.msk.f32.gmra.mrb[78].mxu1 %vm1003_vm2, %v968_v50 }
 0x17e   :  { %2619 = vmatprep.mubr.msk.f32.mxu1 %vm2703_vm0, %v2704_v3 }
 0x17f   :  { %v969_v54 = vmax.f32 %v816_v52, 0.0  ;;  %v3769_v52 = vld [vmem:[%s4311_s7] ss:$0 sm:$0xff] }
 0x180   :  { %v820_v55 = vpop.f32.mrb[82].mxu0 }
 0x181   :  { %v821_v56 = vadd.f32 %v3436_v32, %v820_v55  ;;  %v2427_v57 = vpop.f32.mrb[83].mxu0  ;;  %2620 = vmatmul.mubr.msk.f32.gmra.mrb[80].mxu1 %vm1003_vm2, %v969_v54 }
 0x182   :  { %2622 = vmatprep.mubr.msk.f32.mxu1 %vm2703_vm0, %v2704_v3 }
 0x183   :  { %v970_v58 = vmax.f32 %v821_v56, 0.0 }
 0x184   :  { %v825_v59 = vpop.f32.mrb[84].mxu0 }
 0x185   :  { %v826_v60 = vadd.f32 %v3436_v32, %v825_v59  ;;  %v2430_v61 = vpop.f32.mrb[85].mxu0  ;;  %2623 = vmatmul.mubr.msk.f32.gmra.mrb[82].mxu1 %vm1003_vm2, %v970_v58 }
 0x186   :  { %2625 = vmatprep.mubr.msk.f32.mxu1 %vm2703_vm0, %v2704_v3 }
 0x187   :  { %v971_v62 = vmax.f32 %v826_v60, 0.0 }
 0x188   :  { %v830_v63 = vpop.f32.mrb[86].mxu0 }
 0x189   :  { %v831_v1 = vadd.f32 %v3436_v32, %v830_v63  ;;  %v2433_v2 = vpop.f32.mrb[87].mxu0  ;;  %2626 = vmatmul.mubr.msk.f32.gmra.mrb[84].mxu1 %vm1003_vm2, %v971_v62 }
 0x18a   :  { %2628 = vmatprep.mubr.msk.f32.mxu1 %vm2703_vm0, %v2704_v3 }
 0x18b   :  { %v972_v4 = vmax.f32 %v831_v1, 0.0 }
 0x18c   :  { %v835_v5 = vpop.f32.mrb[88].mxu0 }
 0x18d   :  { %v836_v0 = vadd.f32 %v3436_v32, %v835_v5  ;;  %v2436_v6 = vpop.f32.mrb[89].mxu0  ;;  %2629 = vmatmul.mubr.msk.f32.gmra.mrb[86].mxu1 %vm1003_vm2, %v972_v4 }
 0x18e   :  { %2631 = vmatprep.mubr.msk.f32.mxu1 %vm2703_vm0, %v2704_v3 }
 0x18f   :  { %v973_v7 = vmax.f32 %v836_v0, 0.0 }
 0x190   :  { %v840_v8 = vpop.f32.mrb[90].mxu0 }
 0x191   :  { %v841_v9 = vadd.f32 %v3436_v32, %v840_v8  ;;  %v2439_v10 = vpop.f32.mrb[91].mxu0  ;;  %2632 = vmatmul.mubr.msk.f32.gmra.mrb[88].mxu1 %vm1003_vm2, %v973_v7 }
 0x192   :  { %2634 = vmatprep.mubr.msk.f32.mxu1 %vm2703_vm0, %v2704_v3 }
 0x193   :  { %v974_v11 = vmax.f32 %v841_v9, 0.0 }
 0x194   :  { %v845_v12 = vpop.f32.mrb[92].mxu0 }
 0x195   :  { %v846_v13 = vadd.f32 %v3436_v32, %v845_v12  ;;  %v2442_v14 = vpop.f32.mrb[93].mxu0  ;;  %2635 = vmatmul.mubr.msk.f32.gmra.mrb[90].mxu1 %vm1003_vm2, %v974_v11 }
 0x196   :  { %2637 = vmatprep.mubr.msk.f32.mxu1 %vm2703_vm0, %v2704_v3 }
 0x197   :  { %v975_v15 = vmax.f32 %v846_v13, 0.0 }
 0x198   :  { %v850_v16 = vpop.f32.mrb[94].mxu0 }
 0x199   :  { %v851_v17 = vadd.f32 %v3436_v32, %v850_v16  ;;  %v2445_v18 = vpop.f32.mrb[95].mxu0  ;;  %2638 = vmatmul.mubr.msk.f32.gmra.mrb[92].mxu1 %vm1003_vm2, %v975_v15 }
 0x19a   :  { %2640 = vmatprep.mubr.msk.f32.mxu1 %vm2703_vm0, %v2704_v3 }
 0x19b   :  { %v976_v19 = vmax.f32 %v851_v17, 0.0 }
 0x19c   :  { %v855_v20 = vpop.f32.mrb[96].mxu0 }
 0x19d   :  { %v856_v21 = vadd.f32 %v3436_v32, %v855_v20  ;;  %v2448_v22 = vpop.f32.mrb[97].mxu0  ;;  %2641 = vmatmul.mubr.msk.f32.gmra.mrb[94].mxu1 %vm1003_vm2, %v976_v19  ;;  %v14_v19 = vstv %s4312_s8 }
 0x19e   :  { %2643 = vmatprep.mubr.msk.f32.mxu1 %vm2703_vm0, %v2704_v3  ;;  %15 = vst [vmem:[#allocation2] sm:$0x1] %v14_v19 }
 0x19f   :  { %v977_v23 = vmax.f32 %v856_v21, 0.0 }
 0x1a0   :  { %v860_v24 = vpop.f32.mrb[98].mxu0 }
 0x1a1   :  { %v861_v25 = vadd.f32 %v3436_v32, %v860_v24  ;;  %v2451_v26 = vpop.f32.mrb[99].mxu0  ;;  %2644 = vmatmul.mubr.msk.f32.gmra.mrb[96].mxu1 %vm1003_vm2, %v977_v23 }
 0x1a2   :  { %2646 = vmatprep.mubr.msk.f32.mxu1 %vm2703_vm0, %v2704_v3 }
 0x1a3   :  { %v978_v27 = vmax.f32 %v861_v25, 0.0 }
 0x1a4   :  { %v865_v28 = vpop.f32.mrb[100].mxu0 }
 0x1a5   :  { %v866_v29 = vadd.f32 %v3436_v32, %v865_v28  ;;  %v2454_v30 = vpop.f32.mrb[101].mxu0  ;;  %2647 = vmatmul.mubr.msk.f32.gmra.mrb[98].mxu1 %vm1003_vm2, %v978_v27 }
 0x1a6   :  { %2649 = vmatprep.mubr.msk.f32.mxu1 %vm2703_vm0, %v2704_v3 }
 0x1a7   :  { %v979_v31 = vmax.f32 %v866_v29, 0.0 }
 0x1a8   :  { %v870_v33 = vpop.f32.mrb[102].mxu0 }
 0x1a9   :  { %v871_v34 = vadd.f32 %v3436_v32, %v870_v33  ;;  %v2457_v35 = vpop.f32.mrb[103].mxu0  ;;  %2650 = vmatmul.mubr.msk.f32.gmra.mrb[100].mxu1 %vm1003_vm2, %v979_v31 }
 0x1aa   :  { %2652 = vmatprep.mubr.msk.f32.mxu1 %vm2703_vm0, %v2704_v3 }
 0x1ab   :  { %v980_v36 = vmax.f32 %v871_v34, 0.0 }
 0x1ac   :  { %v875_v37 = vpop.f32.mrb[104].mxu0 }
 0x1ad   :  { %v876_v38 = vadd.f32 %v3436_v32, %v875_v37  ;;  %v2460_v39 = vpop.f32.mrb[105].mxu0  ;;  %2653 = vmatmul.mubr.msk.f32.gmra.mrb[102].mxu1 %vm1003_vm2, %v980_v36 }
 0x1ae   :  { %2655 = vmatprep.mubr.msk.f32.mxu1 %vm2703_vm0, %v2704_v3 }
 0x1af   :  { %v981_v40 = vmax.f32 %v876_v38, 0.0 }
 0x1b0   :  { %v880_v41 = vpop.f32.mrb[106].mxu0 }
 0x1b1   :  { %v881_v42 = vadd.f32 %v3436_v32, %v880_v41  ;;  %v2463_v43 = vpop.f32.mrb[107].mxu0  ;;  %2656 = vmatmul.mubr.msk.f32.gmra.mrb[104].mxu1 %vm1003_vm2, %v981_v40 }
 0x1b2   :  { %2658 = vmatprep.mubr.msk.f32.mxu1 %vm2703_vm0, %v2704_v3 }
 0x1b3   :  { %v982_v45 = vmax.f32 %v881_v42, 0.0 }
 0x1b4   :  { %v885_v46 = vpop.f32.mrb[108].mxu0  ;;  %v1259_v47 = vpop.f32.mrb[0].mxu1 }
 0x1b5   :  { %v886_v48 = vadd.f32 %v3436_v32, %v885_v46  ;;  %v1260_v49 = vadd.f32 %v3757_v44, %v1259_v47  ;;  %v2466_v50 = vpop.f32.mrb[109].mxu0  ;;  %v2501_v51 = vpop.f32.mrb[1].mxu1  ;;  %2659 = vmatmul.mubr.msk.f32.gmra.mrb[106].mxu1 %vm1003_vm2, %v982_v45 }
 0x1b6   :  { %2661 = vmatprep.mubr.msk.f32.mxu1 %vm2703_vm0, %v2704_v3 }
 0x1b7   :  { %v983_v53 = vmax.f32 %v886_v48, 0.0  ;;  %v1573_v54 = vmax.f32 %v1260_v49, 0.0 }
 0x1b8   :  { %v890_v55 = vpop.f32.mrb[110].mxu0  ;;  %v1264_v56 = vpop.f32.mrb[2].mxu1 }
 0x1b9   :  { %v891_v57 = vadd.f32 %v3436_v32, %v890_v55  ;;  %v1265_v58 = vadd.f32 %v3757_v44, %v1264_v56  ;;  %v2469_v59 = vpop.f32.mrb[111].mxu0  ;;  %v2504_v60 = vpop.f32.mrb[3].mxu1  ;;  %2662 = vmatmul.mubr.msk.f32.gmra.mrb[108].mxu1 %vm1003_vm2, %v983_v53  ;;  %v1643_v61 = vmul.f32 %v3769_v52, %v1573_v54 }
 0x1ba   :  { %2664 = vmatprep.mubr.msk.f32.mxu1 %vm2703_vm0, %v2704_v3 }
 0x1bb   :  { %v984_v62 = vmax.f32 %v891_v57, 0.0  ;;  %v1574_v63 = vmax.f32 %v1265_v58, 0.0  ;;  %v1706_v1 = vsel %vm1003_vm2, %v1643_v61, 0.0 }
 0x1bc   :  { %1707 = vadd.xlane.f32.xlu0 %v1706_v1  ;;  %v895_v2 = vpop.f32.mrb[112].mxu0  ;;  %v1269_v4 = vpop.f32.mrb[4].mxu1 }
 0x1bd   :  { %v896_v5 = vadd.f32 %v3436_v32, %v895_v2  ;;  %v1270_v0 = vadd.f32 %v3757_v44, %v1269_v4  ;;  %v2472_v6 = vpop.f32.mrb[113].mxu0  ;;  %v2507_v7 = vpop.f32.mrb[5].mxu1  ;;  %2665 = vmatmul.mubr.msk.f32.gmra.mrb[110].mxu1 %vm1003_vm2, %v984_v62  ;;  %v1644_v8 = vmul.f32 %v3769_v52, %v1574_v63 }
 0x1be   :  { %2667 = vmatprep.mubr.msk.f32.mxu1 %vm2703_vm0, %v2704_v3 }
 0x1bf   :  { %v985_v9 = vmax.f32 %v896_v5, 0.0  ;;  %v1575_v10 = vmax.f32 %v1270_v0, 0.0  ;;  %v1709_v11 = vsel %vm1003_vm2, %v1644_v8, 0.0 }
 0x1c0   :  { %1710 = vadd.xlane.f32.xlu0 %v1709_v11  ;;  %v900_v12 = vpop.f32.mrb[114].mxu0  ;;  %v1274_v13 = vpop.f32.mrb[6].mxu1 }
 0x1c1   :  { %v901_v14 = vadd.f32 %v3436_v32, %v900_v12  ;;  %v1275_v15 = vadd.f32 %v3757_v44, %v1274_v13  ;;  %v2475_v16 = vpop.f32.mrb[115].mxu0  ;;  %v2510_v17 = vpop.f32.mrb[7].mxu1  ;;  %2668 = vmatmul.mubr.msk.f32.gmra.mrb[112].mxu1 %vm1003_vm2, %v985_v9  ;;  %v1645_v18 = vmul.f32 %v3769_v52, %v1575_v10 }
 0x1c2   :  { %2670 = vmatprep.mubr.msk.f32.mxu1 %vm2703_vm0, %v2704_v3 }
 0x1c3   :  { %v986_v20 = vmax.f32 %v901_v14, 0.0  ;;  %v1576_v21 = vmax.f32 %v1275_v15, 0.0  ;;  %v1712_v22 = vsel %vm1003_vm2, %v1645_v18, 0.0 }
 0x1c4   :  { %1713 = vadd.xlane.f32.xlu1 %v1712_v22  ;;  %v905_v23 = vpop.f32.mrb[116].mxu0  ;;  %v1279_v24 = vpop.f32.mrb[8].mxu1 }
 0x1c5   :  { %v906_v25 = vadd.f32 %v3436_v32, %v905_v23  ;;  %v1280_v26 = vadd.f32 %v3757_v44, %v1279_v24  ;;  %v2478_v27 = vpop.f32.mrb[117].mxu0  ;;  %v2513_v28 = vpop.f32.mrb[9].mxu1  ;;  %2671 = vmatmul.mubr.msk.f32.gmra.mrb[114].mxu1 %vm1003_vm2, %v986_v20  ;;  %v1646_v29 = vmul.f32 %v3769_v52, %v1576_v21 }
 0x1c6   :  { %2673 = vmatprep.mubr.msk.f32.mxu1 %vm2703_vm0, %v2704_v3 }
 0x1c7   :  { %v987_v30 = vmax.f32 %v906_v25, 0.0  ;;  %v1577_v31 = vmax.f32 %v1280_v26, 0.0  ;;  %v1715_v33 = vsel %vm1003_vm2, %v1646_v29, 0.0 }
 0x1c8   :  { %1716 = vadd.xlane.f32.xlu1 %v1715_v33  ;;  %v910_v34 = vpop.f32.mrb[118].mxu0  ;;  %v1284_v35 = vpop.f32.mrb[10].mxu1 }
 0x1c9   :  { %v911_v36 = vadd.f32 %v3436_v32, %v910_v34  ;;  %v1285_v37 = vadd.f32 %v3757_v44, %v1284_v35  ;;  %v2481_v38 = vpop.f32.mrb[119].mxu0  ;;  %v2516_v39 = vpop.f32.mrb[11].mxu1  ;;  %2674 = vmatmul.mubr.msk.f32.gmra.mrb[116].mxu1 %vm1003_vm2, %v987_v30  ;;  %v1647_v40 = vmul.f32 %v3769_v52, %v1577_v31 }
 0x1ca   :  { %2676 = vmatprep.mubr.msk.f32.mxu1 %vm2703_vm0, %v2704_v3 }
 0x1cb   :  { %v988_v41 = vmax.f32 %v911_v36, 0.0  ;;  %v1578_v42 = vmax.f32 %v1285_v37, 0.0  ;;  %v1718_v43 = vsel %vm1003_vm2, %v1647_v40, 0.0 }
 0x1cc   :  { %1719 = vadd.xlane.f32.xlu0 %v1718_v43  ;;  %v915_v45 = vpop.f32.mrb[120].mxu0  ;;  %v1289_v46 = vpop.f32.mrb[12].mxu1 }
 0x1cd   :  { %v916_v47 = vadd.f32 %v3436_v32, %v915_v45  ;;  %v1290_v48 = vadd.f32 %v3757_v44, %v1289_v46  ;;  %v2484_v49 = vpop.f32.mrb[121].mxu0  ;;  %v2519_v50 = vpop.f32.mrb[13].mxu1  ;;  %2677 = vmatmul.mubr.msk.f32.gmra.mrb[118].mxu1 %vm1003_vm2, %v988_v41  ;;  %v1648_v51 = vmul.f32 %v3769_v52, %v1578_v42 }
 0x1ce   :  { %2679 = vmatprep.mubr.msk.f32.mxu1 %vm2703_vm0, %v2704_v3 }
 0x1cf   :  { %v989_v53 = vmax.f32 %v916_v47, 0.0  ;;  %v1579_v54 = vmax.f32 %v1290_v48, 0.0  ;;  %v1721_v55 = vsel %vm1003_vm2, %v1648_v51, 0.0 }
 0x1d0   :  { %1722 = vadd.xlane.f32.xlu1 %v1721_v55  ;;  %v920_v56 = vpop.f32.mrb[122].mxu0  ;;  %v1294_v57 = vpop.f32.mrb[14].mxu1 }
 0x1d1   :  { %v921_v58 = vadd.f32 %v3436_v32, %v920_v56  ;;  %v1295_v59 = vadd.f32 %v3757_v44, %v1294_v57  ;;  %v2487_v60 = vpop.f32.mrb[123].mxu0  ;;  %v2522_v61 = vpop.f32.mrb[15].mxu1  ;;  %2680 = vmatmul.mubr.msk.f32.gmra.mrb[120].mxu1 %vm1003_vm2, %v989_v53  ;;  %v1649_v62 = vmul.f32 %v3769_v52, %v1579_v54 }
 0x1d2   :  { %2682 = vmatprep.mubr.msk.f32.mxu1 %vm2703_vm0, %v2704_v3 }
 0x1d3   :  { %v990_v63 = vmax.f32 %v921_v58, 0.0  ;;  %v1580_v1 = vmax.f32 %v1295_v59, 0.0  ;;  %v1724_v2 = vsel %vm1003_vm2, %v1649_v62, 0.0 }
 0x1d4   :  { %1725 = vadd.xlane.f32.xlu0 %v1724_v2  ;;  %v925_v4 = vpop.f32.mrb[124].mxu0  ;;  %v1299_v5 = vpop.f32.mrb[16].mxu1 }
 0x1d5   :  { %v926_v0 = vadd.f32 %v3436_v32, %v925_v4  ;;  %v1300_v6 = vadd.f32 %v3757_v44, %v1299_v5  ;;  %v2490_v7 = vpop.f32.mrb[125].mxu0  ;;  %v2525_v8 = vpop.f32.mrb[17].mxu1  ;;  %2683 = vmatmul.mubr.msk.f32.gmra.mrb[122].mxu1 %vm1003_vm2, %v990_v63  ;;  %v1650_v9 = vmul.f32 %v3769_v52, %v1580_v1 }
 0x1d6   :  { %2685 = vmatprep.mubr.msk.f32.mxu1 %vm2703_vm0, %v2704_v3 }
 0x1d7   :  { %v991_v10 = vmax.f32 %v926_v0, 0.0  ;;  %v1581_v11 = vmax.f32 %v1300_v6, 0.0  ;;  %v1727_v12 = vsel %vm1003_vm2, %v1650_v9, 0.0 }
 0x1d8   :  { %1728 = vadd.xlane.f32.xlu1 %v1727_v12  ;;  %v1304_v13 = vpop.f32.mrb[18].mxu1 }
 0x1d9   :  { %v1305_v14 = vadd.f32 %v3757_v44, %v1304_v13  ;;  %v2528_v32 = vpop.f32.mrb[19].mxu1  ;;  %2686 = vmatmul.mubr.msk.f32.gmra.mrb[124].mxu1 %vm1003_vm2, %v991_v10  ;;  %v1651_v15 = vmul.f32 %v3769_v52, %v1581_v11 }
 0x1db   :  { %v1582_v16 = vmax.f32 %v1305_v14, 0.0  ;;  %v1730_v17 = vsel %vm1003_vm2, %v1651_v15, 0.0 }
 0x1dc   :  { %1731 = vadd.xlane.f32.xlu0 %v1730_v17  ;;  %v1309_v18 = vpop.f32.mrb[20].mxu1 }
 0x1dd   :  { %v1310_v3 = vadd.f32 %v3757_v44, %v1309_v18  ;;  %v2531_v19 = vpop.f32.mrb[21].mxu1  ;;  %v1652_v20 = vmul.f32 %v3769_v52, %v1582_v16 }
 0x1df   :  { %v1583_v21 = vmax.f32 %v1310_v3, 0.0  ;;  %v1733_v22 = vsel %vm1003_vm2, %v1652_v20, 0.0 }
 0x1e0   :  { %1734 = vadd.xlane.f32.xlu1 %v1733_v22  ;;  %v1314_v23 = vpop.f32.mrb[22].mxu1 }
 0x1e1   :  { %v1315_v24 = vadd.f32 %v3757_v44, %v1314_v23  ;;  %v2534_v25 = vpop.f32.mrb[23].mxu1  ;;  %v1653_v26 = vmul.f32 %v3769_v52, %v1583_v21 }
 0x1e3   :  { %v1584_v27 = vmax.f32 %v1315_v24, 0.0  ;;  %v1736_v28 = vsel %vm1003_vm2, %v1653_v26, 0.0 }
 0x1e4   :  { %1737 = vadd.xlane.f32.xlu0 %v1736_v28  ;;  %v1319_v29 = vpop.f32.mrb[24].mxu1 }
 0x1e5   :  { %v1320_v30 = vadd.f32 %v3757_v44, %v1319_v29  ;;  %v2537_v31 = vpop.f32.mrb[25].mxu1  ;;  %v1654_v33 = vmul.f32 %v3769_v52, %v1584_v27 }
 0x1e7   :  { %v1585_v34 = vmax.f32 %v1320_v30, 0.0  ;;  %v1739_v35 = vsel %vm1003_vm2, %v1654_v33, 0.0 }
 0x1e8   :  { %1740 = vadd.xlane.f32.xlu1 %v1739_v35  ;;  %v1324_v36 = vpop.f32.mrb[26].mxu1 }
 0x1e9   :  { %v1325_v37 = vadd.f32 %v3757_v44, %v1324_v36  ;;  %v2540_v38 = vpop.f32.mrb[27].mxu1  ;;  %v1655_v39 = vmul.f32 %v3769_v52, %v1585_v34 }
 0x1eb   :  { %v1586_v40 = vmax.f32 %v1325_v37, 0.0  ;;  %v1742_v41 = vsel %vm1003_vm2, %v1655_v39, 0.0 }
 0x1ec   :  { %1743 = vadd.xlane.f32.xlu0 %v1742_v41  ;;  %v1329_v42 = vpop.f32.mrb[28].mxu1 }
 0x1ed   :  { %v1330_v43 = vadd.f32 %v3757_v44, %v1329_v42  ;;  %v2543_v45 = vpop.f32.mrb[29].mxu1  ;;  %v1656_v46 = vmul.f32 %v3769_v52, %v1586_v40 }
 0x1ef   :  { %v1587_v47 = vmax.f32 %v1330_v43, 0.0  ;;  %v1745_v48 = vsel %vm1003_vm2, %v1656_v46, 0.0 }
 0x1f0   :  { %1746 = vadd.xlane.f32.xlu1 %v1745_v48  ;;  %v1334_v49 = vpop.f32.mrb[30].mxu1 }
 0x1f1   :  { %v1335_v50 = vadd.f32 %v3757_v44, %v1334_v49  ;;  %v2546_v51 = vpop.f32.mrb[31].mxu1  ;;  %v1657_v53 = vmul.f32 %v3769_v52, %v1587_v47 }
 0x1f3   :  { %v1588_v54 = vmax.f32 %v1335_v50, 0.0  ;;  %v1748_v55 = vsel %vm1003_vm2, %v1657_v53, 0.0 }
 0x1f4   :  { %1749 = vadd.xlane.f32.xlu0 %v1748_v55  ;;  %v1339_v56 = vpop.f32.mrb[32].mxu1 }
 0x1f5   :  { %v1340_v57 = vadd.f32 %v3757_v44, %v1339_v56  ;;  %v2549_v58 = vpop.f32.mrb[33].mxu1  ;;  %v1658_v59 = vmul.f32 %v3769_v52, %v1588_v54 }
 0x1f7   :  { %v1589_v60 = vmax.f32 %v1340_v57, 0.0  ;;  %v1751_v61 = vsel %vm1003_vm2, %v1658_v59, 0.0 }
 0x1f8   :  { %1752 = vadd.xlane.f32.xlu1 %v1751_v61  ;;  %v1344_v62 = vpop.f32.mrb[34].mxu1 }
 0x1f9   :  { %v1345_v63 = vadd.f32 %v3757_v44, %v1344_v62  ;;  %v2552_v1 = vpop.f32.mrb[35].mxu1  ;;  %v1659_v2 = vmul.f32 %v3769_v52, %v1589_v60 }
 0x1fb   :  { %v1590_v4 = vmax.f32 %v1345_v63, 0.0  ;;  %v1754_v5 = vsel %vm1003_vm2, %v1659_v2, 0.0 }
 0x1fc   :  { %1755 = vadd.xlane.f32.xlu0 %v1754_v5  ;;  %v1349_v0 = vpop.f32.mrb[36].mxu1 }
 0x1fd   :  { %v1350_v6 = vadd.f32 %v3757_v44, %v1349_v0  ;;  %v2555_v7 = vpop.f32.mrb[37].mxu1  ;;  %v1660_v8 = vmul.f32 %v3769_v52, %v1590_v4 }
 0x1ff   :  { %v1591_v9 = vmax.f32 %v1350_v6, 0.0  ;;  %v1757_v10 = vsel %vm1003_vm2, %v1660_v8, 0.0 }
 0x200   :  { %1758 = vadd.xlane.f32.xlu1 %v1757_v10  ;;  %v1354_v11 = vpop.f32.mrb[38].mxu1 }
 0x201   :  { %v1355_v12 = vadd.f32 %v3757_v44, %v1354_v11  ;;  %v2558_v13 = vpop.f32.mrb[39].mxu1  ;;  %v1661_v14 = vmul.f32 %v3769_v52, %v1591_v9 }
 0x203   :  { %v1592_v32 = vmax.f32 %v1355_v12, 0.0  ;;  %v1760_v15 = vsel %vm1003_vm2, %v1661_v14, 0.0 }
 0x204   :  { %1761 = vadd.xlane.f32.xlu0 %v1760_v15  ;;  %v1359_v16 = vpop.f32.mrb[40].mxu1 }
 0x205   :  { %v1360_v17 = vadd.f32 %v3757_v44, %v1359_v16  ;;  %v2561_v18 = vpop.f32.mrb[41].mxu1  ;;  %v1662_v3 = vmul.f32 %v3769_v52, %v1592_v32 }
 0x207   :  { %v1593_v19 = vmax.f32 %v1360_v17, 0.0  ;;  %v1763_v20 = vsel %vm1003_vm2, %v1662_v3, 0.0 }
 0x208   :  { %1764 = vadd.xlane.f32.xlu1 %v1763_v20  ;;  %v1364_v21 = vpop.f32.mrb[42].mxu1 }
 0x209   :  { %v1365_v22 = vadd.f32 %v3757_v44, %v1364_v21  ;;  %v2564_v23 = vpop.f32.mrb[43].mxu1  ;;  %v1663_v24 = vmul.f32 %v3769_v52, %v1593_v19 }
 0x20b   :  { %v1594_v25 = vmax.f32 %v1365_v22, 0.0  ;;  %v1766_v26 = vsel %vm1003_vm2, %v1663_v24, 0.0 }
 0x20c   :  { %1767 = vadd.xlane.f32.xlu0 %v1766_v26  ;;  %v1369_v27 = vpop.f32.mrb[44].mxu1 }
 0x20d   :  { %v1370_v28 = vadd.f32 %v3757_v44, %v1369_v27  ;;  %v2567_v29 = vpop.f32.mrb[45].mxu1  ;;  %v1664_v30 = vmul.f32 %v3769_v52, %v1594_v25 }
 0x20f   :  { %v1595_v31 = vmax.f32 %v1370_v28, 0.0  ;;  %v1769_v33 = vsel %vm1003_vm2, %v1664_v30, 0.0 }
 0x210   :  { %1770 = vadd.xlane.f32.xlu1 %v1769_v33  ;;  %v1374_v34 = vpop.f32.mrb[46].mxu1 }
 0x211   :  { %v1375_v35 = vadd.f32 %v3757_v44, %v1374_v34  ;;  %v2570_v36 = vpop.f32.mrb[47].mxu1  ;;  %v1665_v37 = vmul.f32 %v3769_v52, %v1595_v31 }
 0x213   :  { %v1596_v38 = vmax.f32 %v1375_v35, 0.0  ;;  %v1772_v39 = vsel %vm1003_vm2, %v1665_v37, 0.0 }
 0x214   :  { %1773 = vadd.xlane.f32.xlu0 %v1772_v39  ;;  %v1379_v40 = vpop.f32.mrb[48].mxu1 }
 0x215   :  { %v1380_v41 = vadd.f32 %v3757_v44, %v1379_v40  ;;  %v2573_v42 = vpop.f32.mrb[49].mxu1  ;;  %v1666_v43 = vmul.f32 %v3769_v52, %v1596_v38 }
 0x217   :  { %v1597_v45 = vmax.f32 %v1380_v41, 0.0  ;;  %v1775_v46 = vsel %vm1003_vm2, %v1666_v43, 0.0 }
 0x218   :  { %1776 = vadd.xlane.f32.xlu1 %v1775_v46  ;;  %v1384_v47 = vpop.f32.mrb[50].mxu1 }
 0x219   :  { %v1385_v48 = vadd.f32 %v3757_v44, %v1384_v47  ;;  %v2576_v49 = vpop.f32.mrb[51].mxu1  ;;  %v1667_v50 = vmul.f32 %v3769_v52, %v1597_v45 }
 0x21b   :  { %v1598_v51 = vmax.f32 %v1385_v48, 0.0  ;;  %v1778_v53 = vsel %vm1003_vm2, %v1667_v50, 0.0 }
 0x21c   :  { %1779 = vadd.xlane.f32.xlu0 %v1778_v53  ;;  %v1389_v54 = vpop.f32.mrb[52].mxu1 }
 0x21d   :  { %v1390_v55 = vadd.f32 %v3757_v44, %v1389_v54  ;;  %v2579_v56 = vpop.f32.mrb[53].mxu1  ;;  %v1668_v57 = vmul.f32 %v3769_v52, %v1598_v51 }
 0x21f   :  { %v1599_v58 = vmax.f32 %v1390_v55, 0.0  ;;  %v1781_v59 = vsel %vm1003_vm2, %v1668_v57, 0.0 }
 0x220   :  { %1782 = vadd.xlane.f32.xlu1 %v1781_v59  ;;  %v1394_v60 = vpop.f32.mrb[54].mxu1 }
 0x221   :  { %v1395_v61 = vadd.f32 %v3757_v44, %v1394_v60  ;;  %v2582_v62 = vpop.f32.mrb[55].mxu1  ;;  %v1669_v63 = vmul.f32 %v3769_v52, %v1599_v58  ;;  %v3915_v58 = vld [vmem:[#allocation2] ss:$0 sm:$0xff] }
 0x223   :  { %v1600_v1 = vmax.f32 %v1395_v61, 0.0  ;;  %v1784_v2 = vsel %vm1003_vm2, %v1669_v63, 0.0 }
 0x224   :  { %1785 = vadd.xlane.f32.xlu0 %v1784_v2  ;;  %v1399_v4 = vpop.f32.mrb[56].mxu1 }
 0x225   :  { %v1400_v5 = vadd.f32 %v3757_v44, %v1399_v4  ;;  %v2585_v0 = vpop.f32.mrb[57].mxu1  ;;  %v1670_v6 = vmul.f32 %v3769_v52, %v1600_v1 }
 0x227   :  { %v1601_v7 = vmax.f32 %v1400_v5, 0.0  ;;  %v1787_v8 = vsel %vm1003_vm2, %v1670_v6, 0.0 }
 0x228   :  { %1788 = vadd.xlane.f32.xlu1 %v1787_v8  ;;  %v1404_v9 = vpop.f32.mrb[58].mxu1 }
 0x229   :  { %v1405_v10 = vadd.f32 %v3757_v44, %v1404_v9  ;;  %v2588_v11 = vpop.f32.mrb[59].mxu1  ;;  %v1671_v12 = vmul.f32 %v3769_v52, %v1601_v7 }
 0x22b   :  { %v1602_v13 = vmax.f32 %v1405_v10, 0.0  ;;  %v1790_v14 = vsel %vm1003_vm2, %v1671_v12, 0.0 }
 0x22c   :  { %1791 = vadd.xlane.f32.xlu0 %v1790_v14  ;;  %v1409_v32 = vpop.f32.mrb[60].mxu1 }
 0x22d   :  { %v1410_v15 = vadd.f32 %v3757_v44, %v1409_v32  ;;  %v2591_v16 = vpop.f32.mrb[61].mxu1  ;;  %v1672_v17 = vmul.f32 %v3769_v52, %v1602_v13 }
 0x22f   :  { %v1603_v18 = vmax.f32 %v1410_v15, 0.0  ;;  %v1793_v3 = vsel %vm1003_vm2, %v1672_v17, 0.0 }
 0x230   :  { %1794 = vadd.xlane.f32.xlu1 %v1793_v3  ;;  %v1414_v19 = vpop.f32.mrb[62].mxu1 }
 0x231   :  { %v1415_v20 = vadd.f32 %v3757_v44, %v1414_v19  ;;  %v2594_v21 = vpop.f32.mrb[63].mxu1  ;;  %v1673_v22 = vmul.f32 %v3769_v52, %v1603_v18 }
 0x233   :  { %v1604_v23 = vmax.f32 %v1415_v20, 0.0  ;;  %v1796_v24 = vsel %vm1003_vm2, %v1673_v22, 0.0 }
 0x234   :  { %1797 = vadd.xlane.f32.xlu0 %v1796_v24  ;;  %v1419_v25 = vpop.f32.mrb[64].mxu1 }
 0x235   :  { %v1420_v26 = vadd.f32 %v3757_v44, %v1419_v25  ;;  %v2597_v27 = vpop.f32.mrb[65].mxu1  ;;  %v1674_v28 = vmul.f32 %v3769_v52, %v1604_v23 }
 0x237   :  { %v1605_v29 = vmax.f32 %v1420_v26, 0.0  ;;  %v1799_v30 = vsel %vm1003_vm2, %v1674_v28, 0.0 }
 0x238   :  { %1800 = vadd.xlane.f32.xlu1 %v1799_v30  ;;  %v1424_v31 = vpop.f32.mrb[66].mxu1 }
 0x239   :  { %v1425_v33 = vadd.f32 %v3757_v44, %v1424_v31  ;;  %v2600_v34 = vpop.f32.mrb[67].mxu1  ;;  %v1675_v35 = vmul.f32 %v3769_v52, %v1605_v29 }
 0x23b   :  { %v1606_v36 = vmax.f32 %v1425_v33, 0.0  ;;  %v1802_v37 = vsel %vm1003_vm2, %v1675_v35, 0.0 }
 0x23c   :  { %1803 = vadd.xlane.f32.xlu0 %v1802_v37  ;;  %v1429_v38 = vpop.f32.mrb[68].mxu1 }
 0x23d   :  { %v1430_v39 = vadd.f32 %v3757_v44, %v1429_v38  ;;  %v2603_v40 = vpop.f32.mrb[69].mxu1  ;;  %v1676_v41 = vmul.f32 %v3769_v52, %v1606_v36 }
 0x23f   :  { %v1607_v42 = vmax.f32 %v1430_v39, 0.0  ;;  %v1805_v43 = vsel %vm1003_vm2, %v1676_v41, 0.0 }
 0x240   :  { %1806 = vadd.xlane.f32.xlu1 %v1805_v43  ;;  %v1434_v45 = vpop.f32.mrb[70].mxu1 }
 0x241   :  { %v1435_v46 = vadd.f32 %v3757_v44, %v1434_v45  ;;  %v2606_v47 = vpop.f32.mrb[71].mxu1  ;;  %v1677_v48 = vmul.f32 %v3769_v52, %v1607_v42 }
 0x243   :  { %v1608_v49 = vmax.f32 %v1435_v46, 0.0  ;;  %v1808_v50 = vsel %vm1003_vm2, %v1677_v48, 0.0 }
 0x244   :  { %1809 = vadd.xlane.f32.xlu0 %v1808_v50  ;;  %v1439_v51 = vpop.f32.mrb[72].mxu1 }
 0x245   :  { %v1440_v53 = vadd.f32 %v3757_v44, %v1439_v51  ;;  %v2609_v54 = vpop.f32.mrb[73].mxu1  ;;  %v1678_v55 = vmul.f32 %v3769_v52, %v1608_v49 }
 0x247   :  { %v1609_v56 = vmax.f32 %v1440_v53, 0.0  ;;  %v1811_v57 = vsel %vm1003_vm2, %v1678_v55, 0.0 }
 0x248   :  { %1812 = vadd.xlane.f32.xlu1 %v1811_v57  ;;  %v1444_v59 = vpop.f32.mrb[74].mxu1 }
 0x249   :  { %v1445_v60 = vadd.f32 %v3757_v44, %v1444_v59  ;;  %v1708_v61 = vpop.xlane.xlu0 %1707  ;;  %v2612_v62 = vpop.f32.mrb[75].mxu1  ;;  %v1679_v63 = vmul.f32 %v3769_v52, %v1609_v56 }
 0x24a   :  { %v1902_v1 = vadd.f32 %v3915_v58, %v1708_v61 }
 0x24b   :  { %v1610_v2 = vmax.f32 %v1445_v60, 0.0  ;;  %v1814_v4 = vsel %vm1003_vm2, %v1679_v63, 0.0 }
 0x24c   :  { %1966 = vst.msk [vmem:[%s4313_s9] sm:$0xff] %vm1965_vm3, %v1902_v1  ;;  %1815 = vadd.xlane.f32.xlu0 %v1814_v4  ;;  %v1449_v5 = vpop.f32.mrb[76].mxu1 }
 0x24d   :  { %v1450_v0 = vadd.f32 %v3757_v44, %v1449_v5  ;;  %v1711_v6 = vpop.xlane.xlu0 %1710  ;;  %v2615_v7 = vpop.f32.mrb[77].mxu1  ;;  %v1680_v8 = vmul.f32 %v3769_v52, %v1610_v2 }
 0x24e   :  { %v1903_v9 = vadd.f32 %v3915_v58, %v1711_v6 }
 0x24f   :  { %v1611_v10 = vmax.f32 %v1450_v0, 0.0  ;;  %v1817_v11 = vsel %vm1003_vm2, %v1680_v8, 0.0 }
 0x250   :  { %1967 = vst.msk [vmem:[%s4313_s9 + $0x8] sm:$0xff] %vm1965_vm3, %v1903_v9  ;;  %1818 = vadd.xlane.f32.xlu1 %v1817_v11  ;;  %v1454_v12 = vpop.f32.mrb[78].mxu1 }
 0x251   :  { %v1455_v13 = vadd.f32 %v3757_v44, %v1454_v12  ;;  %v1714_v14 = vpop.xlane.xlu1 %1713  ;;  %v2618_v32 = vpop.f32.mrb[79].mxu1  ;;  %v1681_v15 = vmul.f32 %v3769_v52, %v1611_v10 }
 0x252   :  { %v1904_v16 = vadd.f32 %v3915_v58, %v1714_v14 }
 0x253   :  { %v1612_v17 = vmax.f32 %v1455_v13, 0.0  ;;  %v1820_v18 = vsel %vm1003_vm2, %v1681_v15, 0.0 }
 0x254   :  { %1968 = vst.msk [vmem:[%s4313_s9 + $0x10] sm:$0xff] %vm1965_vm3, %v1904_v16  ;;  %1821 = vadd.xlane.f32.xlu0 %v1820_v18  ;;  %v1459_v3 = vpop.f32.mrb[80].mxu1 }
 0x255   :  { %v1460_v19 = vadd.f32 %v3757_v44, %v1459_v3  ;;  %v1717_v20 = vpop.xlane.xlu1 %1716  ;;  %v2621_v21 = vpop.f32.mrb[81].mxu1  ;;  %v1682_v22 = vmul.f32 %v3769_v52, %v1612_v17 }
 0x256   :  { %v1905_v23 = vadd.f32 %v3915_v58, %v1717_v20 }
 0x257   :  { %v1613_v24 = vmax.f32 %v1460_v19, 0.0  ;;  %v1823_v25 = vsel %vm1003_vm2, %v1682_v22, 0.0 }
 0x258   :  { %1969 = vst.msk [vmem:[%s4313_s9 + $0x18] sm:$0xff] %vm1965_vm3, %v1905_v23  ;;  %1824 = vadd.xlane.f32.xlu1 %v1823_v25  ;;  %v1464_v26 = vpop.f32.mrb[82].mxu1 }
 0x259   :  { %v1465_v27 = vadd.f32 %v3757_v44, %v1464_v26  ;;  %v1720_v28 = vpop.xlane.xlu0 %1719  ;;  %v2624_v29 = vpop.f32.mrb[83].mxu1  ;;  %v1683_v30 = vmul.f32 %v3769_v52, %v1613_v24 }
 0x25a   :  { %v1906_v31 = vadd.f32 %v3915_v58, %v1720_v28 }
 0x25b   :  { %v1614_v33 = vmax.f32 %v1465_v27, 0.0  ;;  %v1826_v34 = vsel %vm1003_vm2, %v1683_v30, 0.0 }
 0x25c   :  { %1970 = vst.msk [vmem:[%s4313_s9 + $0x20] sm:$0xff] %vm1965_vm3, %v1906_v31  ;;  %1827 = vadd.xlane.f32.xlu0 %v1826_v34  ;;  %v1469_v35 = vpop.f32.mrb[84].mxu1 }
 0x25d   :  { %v1470_v36 = vadd.f32 %v3757_v44, %v1469_v35  ;;  %v1723_v37 = vpop.xlane.xlu1 %1722  ;;  %v2627_v38 = vpop.f32.mrb[85].mxu1  ;;  %v1684_v39 = vmul.f32 %v3769_v52, %v1614_v33 }
 0x25e   :  { %v1907_v40 = vadd.f32 %v3915_v58, %v1723_v37 }
 0x25f   :  { %v1615_v41 = vmax.f32 %v1470_v36, 0.0  ;;  %v1829_v42 = vsel %vm1003_vm2, %v1684_v39, 0.0 }
 0x260   :  { %1971 = vst.msk [vmem:[%s4313_s9 + $0x28] sm:$0xff] %vm1965_vm3, %v1907_v40  ;;  %1830 = vadd.xlane.f32.xlu1 %v1829_v42  ;;  %v1474_v43 = vpop.f32.mrb[86].mxu1 }
 0x261   :  { %v1475_v45 = vadd.f32 %v3757_v44, %v1474_v43  ;;  %v1726_v46 = vpop.xlane.xlu0 %1725  ;;  %v2630_v47 = vpop.f32.mrb[87].mxu1  ;;  %v1685_v48 = vmul.f32 %v3769_v52, %v1615_v41 }
 0x262   :  { %v1908_v49 = vadd.f32 %v3915_v58, %v1726_v46 }
 0x263   :  { %v1616_v50 = vmax.f32 %v1475_v45, 0.0  ;;  %v1832_v51 = vsel %vm1003_vm2, %v1685_v48, 0.0 }
 0x264   :  { %1972 = vst.msk [vmem:[%s4313_s9 + $0x30] sm:$0xff] %vm1965_vm3, %v1908_v49  ;;  %1833 = vadd.xlane.f32.xlu0 %v1832_v51  ;;  %v1479_v53 = vpop.f32.mrb[88].mxu1 }
 0x265   :  { %v1480_v54 = vadd.f32 %v3757_v44, %v1479_v53  ;;  %v1729_v55 = vpop.xlane.xlu1 %1728  ;;  %v2633_v56 = vpop.f32.mrb[89].mxu1  ;;  %v1686_v57 = vmul.f32 %v3769_v52, %v1616_v50 }
 0x266   :  { %v1909_v59 = vadd.f32 %v3915_v58, %v1729_v55 }
 0x267   :  { %v1617_v60 = vmax.f32 %v1480_v54, 0.0  ;;  %v1835_v61 = vsel %vm1003_vm2, %v1686_v57, 0.0 }
 0x268   :  { %1973 = vst.msk [vmem:[%s4313_s9 + $0x38] sm:$0xff] %vm1965_vm3, %v1909_v59  ;;  %1836 = vadd.xlane.f32.xlu1 %v1835_v61  ;;  %v1484_v62 = vpop.f32.mrb[90].mxu1 }
 0x269   :  { %v1485_v63 = vadd.f32 %v3757_v44, %v1484_v62  ;;  %v1732_v1 = vpop.xlane.xlu0 %1731  ;;  %v2636_v2 = vpop.f32.mrb[91].mxu1  ;;  %v1687_v4 = vmul.f32 %v3769_v52, %v1617_v60 }
 0x26a   :  { %v1910_v5 = vadd.f32 %v3915_v58, %v1732_v1 }
 0x26b   :  { %v1618_v0 = vmax.f32 %v1485_v63, 0.0  ;;  %v1838_v6 = vsel %vm1003_vm2, %v1687_v4, 0.0 }
 0x26c   :  { %1974 = vst.msk [vmem:[%s4313_s9 + $0x40] sm:$0xff] %vm1965_vm3, %v1910_v5  ;;  %1839 = vadd.xlane.f32.xlu0 %v1838_v6  ;;  %v1489_v7 = vpop.f32.mrb[92].mxu1 }
 0x26d   :  { %v1490_v8 = vadd.f32 %v3757_v44, %v1489_v7  ;;  %v1735_v9 = vpop.xlane.xlu1 %1734  ;;  %v2639_v10 = vpop.f32.mrb[93].mxu1  ;;  %v1688_v11 = vmul.f32 %v3769_v52, %v1618_v0 }
 0x26e   :  { %v1911_v12 = vadd.f32 %v3915_v58, %v1735_v9 }
 0x26f   :  { %v1619_v13 = vmax.f32 %v1490_v8, 0.0  ;;  %v1841_v14 = vsel %vm1003_vm2, %v1688_v11, 0.0 }
 0x270   :  { %1975 = vst.msk [vmem:[%s4313_s9 + $0x48] sm:$0xff] %vm1965_vm3, %v1911_v12  ;;  %1842 = vadd.xlane.f32.xlu1 %v1841_v14  ;;  %v1494_v32 = vpop.f32.mrb[94].mxu1 }
 0x271   :  { %v1495_v15 = vadd.f32 %v3757_v44, %v1494_v32  ;;  %v1738_v16 = vpop.xlane.xlu0 %1737  ;;  %v2642_v17 = vpop.f32.mrb[95].mxu1  ;;  %v1689_v18 = vmul.f32 %v3769_v52, %v1619_v13 }
 0x272   :  { %v1912_v3 = vadd.f32 %v3915_v58, %v1738_v16 }
 0x273   :  { %v1620_v19 = vmax.f32 %v1495_v15, 0.0  ;;  %v1844_v20 = vsel %vm1003_vm2, %v1689_v18, 0.0 }
 0x274   :  { %1976 = vst.msk [vmem:[%s4313_s9 + $0x50] sm:$0xff] %vm1965_vm3, %v1912_v3  ;;  %1845 = vadd.xlane.f32.xlu0 %v1844_v20  ;;  %v1499_v21 = vpop.f32.mrb[96].mxu1 }
 0x275   :  { %v1500_v22 = vadd.f32 %v3757_v44, %v1499_v21  ;;  %v1741_v23 = vpop.xlane.xlu1 %1740  ;;  %v2645_v24 = vpop.f32.mrb[97].mxu1  ;;  %v1690_v25 = vmul.f32 %v3769_v52, %v1620_v19 }
 0x276   :  { %v1913_v26 = vadd.f32 %v3915_v58, %v1741_v23 }
 0x277   :  { %v1621_v27 = vmax.f32 %v1500_v22, 0.0  ;;  %v1847_v28 = vsel %vm1003_vm2, %v1690_v25, 0.0 }
 0x278   :  { %1977 = vst.msk [vmem:[%s4313_s9 + $0x58] sm:$0xff] %vm1965_vm3, %v1913_v26  ;;  %1848 = vadd.xlane.f32.xlu1 %v1847_v28  ;;  %v1504_v29 = vpop.f32.mrb[98].mxu1 }
 0x279   :  { %v1505_v30 = vadd.f32 %v3757_v44, %v1504_v29  ;;  %v1744_v31 = vpop.xlane.xlu0 %1743  ;;  %v2648_v33 = vpop.f32.mrb[99].mxu1  ;;  %v1691_v34 = vmul.f32 %v3769_v52, %v1621_v27 }
 0x27a   :  { %v1914_v35 = vadd.f32 %v3915_v58, %v1744_v31 }
 0x27b   :  { %v1622_v36 = vmax.f32 %v1505_v30, 0.0  ;;  %v1850_v37 = vsel %vm1003_vm2, %v1691_v34, 0.0 }
 0x27c   :  { %1978 = vst.msk [vmem:[%s4313_s9 + $0x60] sm:$0xff] %vm1965_vm3, %v1914_v35  ;;  %1851 = vadd.xlane.f32.xlu0 %v1850_v37  ;;  %v1509_v38 = vpop.f32.mrb[100].mxu1  ;;  %v2701_v37 = vld [vmem:[%s4311_s7] ss:$0 sm:$0xff] }
 0x27d   :  { %v1510_v39 = vadd.f32 %v3757_v44, %v1509_v38  ;;  %v1747_v40 = vpop.xlane.xlu1 %1746  ;;  %v2651_v41 = vpop.f32.mrb[101].mxu1  ;;  %v1692_v42 = vmul.f32 %v3769_v52, %v1622_v36 }
 0x27e   :  { %v1915_v43 = vadd.f32 %v3915_v58, %v1747_v40 }
 0x27f   :  { %v1623_v45 = vmax.f32 %v1510_v39, 0.0  ;;  %v1853_v46 = vsel %vm1003_vm2, %v1692_v42, 0.0 }
 0x280   :  { %1979 = vst.msk [vmem:[%s4313_s9 + $0x68] sm:$0xff] %vm1965_vm3, %v1915_v43  ;;  %1854 = vadd.xlane.f32.xlu1 %v1853_v46  ;;  %v1514_v47 = vpop.f32.mrb[102].mxu1 }
 0x281   :  { %v1515_v48 = vadd.f32 %v3757_v44, %v1514_v47  ;;  %v1750_v49 = vpop.xlane.xlu0 %1749  ;;  %v2654_v50 = vpop.f32.mrb[103].mxu1  ;;  %v1693_v51 = vmul.f32 %v3769_v52, %v1623_v45 }
 0x282   :  { %v1916_v53 = vadd.f32 %v3915_v58, %v1750_v49 }
 0x283   :  { %v1624_v54 = vmax.f32 %v1515_v48, 0.0  ;;  %v1856_v55 = vsel %vm1003_vm2, %v1693_v51, 0.0 }
 0x284   :  { %1980 = vst.msk [vmem:[%s4313_s9 + $0x70] sm:$0xff] %vm1965_vm3, %v1916_v53  ;;  %1857 = vadd.xlane.f32.xlu0 %v1856_v55  ;;  %v1519_v56 = vpop.f32.mrb[104].mxu1 }
 0x285   :  { %v1520_v57 = vadd.f32 %v3757_v44, %v1519_v56  ;;  %v1753_v59 = vpop.xlane.xlu1 %1752  ;;  %v2657_v60 = vpop.f32.mrb[105].mxu1  ;;  %v1694_v61 = vmul.f32 %v3769_v52, %v1624_v54 }
 0x286   :  { %v1917_v62 = vadd.f32 %v3915_v58, %v1753_v59 }
 0x287   :  { %v1625_v63 = vmax.f32 %v1520_v57, 0.0  ;;  %v1859_v1 = vsel %vm1003_vm2, %v1694_v61, 0.0 }
 0x288   :  { %1981 = vst.msk [vmem:[%s4313_s9 + $0x78] sm:$0xff] %vm1965_vm3, %v1917_v62  ;;  %1860 = vadd.xlane.f32.xlu1 %v1859_v1  ;;  %v1524_v2 = vpop.f32.mrb[106].mxu1 }
 0x289   :  { %v1525_v4 = vadd.f32 %v3757_v44, %v1524_v2  ;;  %v1756_v5 = vpop.xlane.xlu0 %1755  ;;  %v2660_v0 = vpop.f32.mrb[107].mxu1  ;;  %v1695_v6 = vmul.f32 %v3769_v52, %v1625_v63 }
 0x28a   :  { %v1918_v7 = vadd.f32 %v3915_v58, %v1756_v5 }
 0x28b   :  { %v1626_v8 = vmax.f32 %v1525_v4, 0.0  ;;  %v1862_v9 = vsel %vm1003_vm2, %v1695_v6, 0.0 }
 0x28c   :  { %1982 = vst.msk [vmem:[%s4313_s9 + $0x80] sm:$0xff] %vm1965_vm3, %v1918_v7  ;;  %1863 = vadd.xlane.f32.xlu0 %v1862_v9  ;;  %v1529_v10 = vpop.f32.mrb[108].mxu1 }
 0x28d   :  { %v1530_v11 = vadd.f32 %v3757_v44, %v1529_v10  ;;  %v1759_v12 = vpop.xlane.xlu1 %1758  ;;  %v2663_v13 = vpop.f32.mrb[109].mxu1  ;;  %v1696_v14 = vmul.f32 %v3769_v52, %v1626_v8 }
 0x28e   :  { %v1919_v32 = vadd.f32 %v3915_v58, %v1759_v12 }
 0x28f   :  { %v1627_v15 = vmax.f32 %v1530_v11, 0.0  ;;  %v1865_v16 = vsel %vm1003_vm2, %v1696_v14, 0.0 }
 0x290   :  { %1983 = vst.msk [vmem:[%s4313_s9 + $0x88] sm:$0xff] %vm1965_vm3, %v1919_v32  ;;  %1866 = vadd.xlane.f32.xlu1 %v1865_v16  ;;  %v1534_v17 = vpop.f32.mrb[110].mxu1 }
 0x291   :  { %v1535_v18 = vadd.f32 %v3757_v44, %v1534_v17  ;;  %v1762_v3 = vpop.xlane.xlu0 %1761  ;;  %v2666_v19 = vpop.f32.mrb[111].mxu1  ;;  %v1697_v20 = vmul.f32 %v3769_v52, %v1627_v15  ;;  %v2700_v44 = vld [vmem:[%s4310_s6] ss:$0 sm:$0xff] }
 0x292   :  { %v1920_v21 = vadd.f32 %v3915_v58, %v1762_v3 }
 0x293   :  { %v1628_v22 = vmax.f32 %v1535_v18, 0.0  ;;  %v1868_v23 = vsel %vm1003_vm2, %v1697_v20, 0.0 }
 0x294   :  { %1984 = vst.msk [vmem:[%s4313_s9 + $0x90] sm:$0xff] %vm1965_vm3, %v1920_v21  ;;  %1869 = vadd.xlane.f32.xlu0 %v1868_v23  ;;  %v1539_v24 = vpop.f32.mrb[112].mxu1 }
 0x295   :  { %v1540_v25 = vadd.f32 %v2700_v44, %v1539_v24  ;;  %v1765_v26 = vpop.xlane.xlu1 %1764  ;;  %v2669_v27 = vpop.f32.mrb[113].mxu1  ;;  %v1698_v28 = vmul.f32 %v3769_v52, %v1628_v22 }
 0x296   :  { %v1921_v29 = vadd.f32 %v3915_v58, %v1765_v26 }
 0x297   :  { %v1629_v30 = vmax.f32 %v1540_v25, 0.0  ;;  %v1871_v31 = vsel %vm1003_vm2, %v1698_v28, 0.0 }
 0x298   :  { %1985 = vst.msk [vmem:[%s4313_s9 + $0x98] sm:$0xff] %vm1965_vm3, %v1921_v29  ;;  %1872 = vadd.xlane.f32.xlu1 %v1871_v31  ;;  %v1544_v33 = vpop.f32.mrb[114].mxu1 }
 0x299   :  { %v1545_v34 = vadd.f32 %v2700_v44, %v1544_v33  ;;  %v1768_v35 = vpop.xlane.xlu0 %1767  ;;  %v2672_v36 = vpop.f32.mrb[115].mxu1  ;;  %v1699_v52 = vmul.f32 %v2701_v37, %v1629_v30 }
 0x29a   :  { %v1922_v38 = vadd.f32 %v3915_v58, %v1768_v35 }
 0x29b   :  { %v1630_v39 = vmax.f32 %v1545_v34, 0.0  ;;  %v1874_v40 = vsel %vm1003_vm2, %v1699_v52, 0.0 }
 0x29c   :  { %1986 = vst.msk [vmem:[%s4313_s9 + $0xa0] sm:$0xff] %vm1965_vm3, %v1922_v38  ;;  %1875 = vadd.xlane.f32.xlu0 %v1874_v40  ;;  %v1549_v41 = vpop.f32.mrb[116].mxu1 }
 0x29d   :  { %v1550_v42 = vadd.f32 %v2700_v44, %v1549_v41  ;;  %v1771_v43 = vpop.xlane.xlu1 %1770  ;;  %v2675_v45 = vpop.f32.mrb[117].mxu1  ;;  %v1700_v46 = vmul.f32 %v2701_v37, %v1630_v39 }
 0x29e   :  { %v1923_v47 = vadd.f32 %v3915_v58, %v1771_v43 }
 0x29f   :  { %v1631_v48 = vmax.f32 %v1550_v42, 0.0  ;;  %v1877_v49 = vsel %vm1003_vm2, %v1700_v46, 0.0 }
 0x2a0   :  { %1987 = vst.msk [vmem:[%s4313_s9 + $0xa8] sm:$0xff] %vm1965_vm3, %v1923_v47  ;;  %1878 = vadd.xlane.f32.xlu1 %v1877_v49  ;;  %v1554_v50 = vpop.f32.mrb[118].mxu1 }
 0x2a1   :  { %v1555_v51 = vadd.f32 %v2700_v44, %v1554_v50  ;;  %v1774_v53 = vpop.xlane.xlu0 %1773  ;;  %v2678_v54 = vpop.f32.mrb[119].mxu1  ;;  %v1701_v55 = vmul.f32 %v2701_v37, %v1631_v48 }
 0x2a2   :  { %v1924_v56 = vadd.f32 %v3915_v58, %v1774_v53 }
 0x2a3   :  { %v1632_v57 = vmax.f32 %v1555_v51, 0.0  ;;  %v1880_v59 = vsel %vm1003_vm2, %v1701_v55, 0.0 }
 0x2a4   :  { %1988 = vst.msk [vmem:[%s4313_s9 + $0xb0] sm:$0xff] %vm1965_vm3, %v1924_v56  ;;  %1881 = vadd.xlane.f32.xlu0 %v1880_v59  ;;  %v1559_v60 = vpop.f32.mrb[120].mxu1 }
 0x2a5   :  { %v1560_v61 = vadd.f32 %v2700_v44, %v1559_v60  ;;  %v1777_v62 = vpop.xlane.xlu1 %1776  ;;  %v2681_v63 = vpop.f32.mrb[121].mxu1  ;;  %v1702_v1 = vmul.f32 %v2701_v37, %v1632_v57 }
 0x2a6   :  { %v1925_v2 = vadd.f32 %v3915_v58, %v1777_v62 }
 0x2a7   :  { %v1633_v4 = vmax.f32 %v1560_v61, 0.0  ;;  %v1883_v5 = vsel %vm1003_vm2, %v1702_v1, 0.0 }
 0x2a8   :  { %1989 = vst.msk [vmem:[%s4313_s9 + $0xb8] sm:$0xff] %vm1965_vm3, %v1925_v2  ;;  %1884 = vadd.xlane.f32.xlu1 %v1883_v5  ;;  %v1564_v0 = vpop.f32.mrb[122].mxu1 }
 0x2a9   :  { %v1565_v6 = vadd.f32 %v2700_v44, %v1564_v0  ;;  %v1780_v7 = vpop.xlane.xlu0 %1779  ;;  %v2684_v8 = vpop.f32.mrb[123].mxu1  ;;  %v1703_v9 = vmul.f32 %v2701_v37, %v1633_v4 }
 0x2aa   :  { %v1926_v10 = vadd.f32 %v3915_v58, %v1780_v7 }
 0x2ab   :  { %v1634_v11 = vmax.f32 %v1565_v6, 0.0  ;;  %v1886_v12 = vsel %vm1003_vm2, %v1703_v9, 0.0 }
 0x2ac   :  { %1990 = vst.msk [vmem:[%s4313_s9 + $0xc0] sm:$0xff] %vm1965_vm3, %v1926_v10  ;;  %1887 = vadd.xlane.f32.xlu0 %v1886_v12  ;;  %v1569_v13 = vpop.f32.mrb[124].mxu1 }
 0x2ad   :  { %v1570_v14 = vadd.f32 %v2700_v44, %v1569_v13  ;;  %v1783_v32 = vpop.xlane.xlu1 %1782  ;;  %v2687_v15 = vpop.f32.mrb[125].mxu1  ;;  %v1704_v16 = vmul.f32 %v2701_v37, %v1634_v11 }
 0x2ae   :  { %v1927_v17 = vadd.f32 %v3915_v58, %v1783_v32 }
 0x2af   :  { %v1635_v18 = vmax.f32 %v1570_v14, 0.0  ;;  %v1889_v3 = vsel %vm1003_vm2, %v1704_v16, 0.0 }
 0x2b0   :  { %1991 = vst.msk [vmem:[%s4313_s9 + $0xc8] sm:$0xff] %vm1965_vm3, %v1927_v17  ;;  %1890 = vadd.xlane.f32.xlu1 %v1889_v3 }
 0x2b1   :  { %v1786_v19 = vpop.xlane.xlu0 %1785  ;;  %v1705_v20 = vmul.f32 %v2701_v37, %v1635_v18 }
 0x2b2   :  { %v1928_v21 = vadd.f32 %v3915_v58, %v1786_v19 }
 0x2b3   :  { %v1892_v22 = vsel %vm1003_vm2, %v1705_v20, 0.0 }
 0x2b4   :  { %1992 = vst.msk [vmem:[%s4313_s9 + $0xd0] sm:$0xff] %vm1965_vm3, %v1928_v21  ;;  %1893 = vadd.xlane.f32.xlu0 %v1892_v22 }
 0x2b5   :  { %v1789_v23 = vpop.xlane.xlu1 %1788 }
 0x2b6   :  { %v1929_v24 = vadd.f32 %v3915_v58, %v1789_v23 }
 0x2b8   :  { %1993 = vst.msk [vmem:[%s4313_s9 + $0xd8] sm:$0xff] %vm1965_vm3, %v1929_v24 }
 0x2b9   :  { %v1792_v44 = vpop.xlane.xlu0 %1791 }
 0x2ba   :  { %v1930_v25 = vadd.f32 %v3915_v58, %v1792_v44 }
 0x2bc   :  { %1994 = vst.msk [vmem:[%s4313_s9 + $0xe0] sm:$0xff] %vm1965_vm3, %v1930_v25 }
 0x2bd   :  { %v1795_v26 = vpop.xlane.xlu1 %1794 }
 0x2be   :  { %v1931_v27 = vadd.f32 %v3915_v58, %v1795_v26 }
 0x2c0   :  { %1995 = vst.msk [vmem:[%s4313_s9 + $0xe8] sm:$0xff] %vm1965_vm3, %v1931_v27 }
 0x2c1   :  { %v1798_v28 = vpop.xlane.xlu0 %1797 }
 0x2c2   :  { %v1932_v29 = vadd.f32 %v3915_v58, %v1798_v28 }
 0x2c4   :  { %1996 = vst.msk [vmem:[%s4313_s9 + $0xf0] sm:$0xff] %vm1965_vm3, %v1932_v29 }
 0x2c5   :  { %v1801_v30 = vpop.xlane.xlu1 %1800 }
 0x2c6   :  { %v1933_v31 = vadd.f32 %v3915_v58, %v1801_v30 }
 0x2c8   :  { %1997 = vst.msk [vmem:[%s4313_s9 + $0xf8] sm:$0xff] %vm1965_vm3, %v1933_v31 }
 0x2c9   :  { %v1804_v33 = vpop.xlane.xlu0 %1803 }
 0x2ca   :  { %v1934_v34 = vadd.f32 %v3915_v58, %v1804_v33 }
 0x2cc   :  { %1998 = vst.msk [vmem:[%s4313_s9 + $0x100] sm:$0xff] %vm1965_vm3, %v1934_v34 }
 0x2cd   :  { %v1807_v35 = vpop.xlane.xlu1 %1806 }
 0x2ce   :  { %v1935_v36 = vadd.f32 %v3915_v58, %v1807_v35 }
 0x2d0   :  { %1999 = vst.msk [vmem:[%s4313_s9 + $0x108] sm:$0xff] %vm1965_vm3, %v1935_v36 }
 0x2d1   :  { %v1810_v37 = vpop.xlane.xlu0 %1809 }
 0x2d2   :  { %v1936_v52 = vadd.f32 %v3915_v58, %v1810_v37 }
 0x2d4   :  { %2000 = vst.msk [vmem:[%s4313_s9 + $0x110] sm:$0xff] %vm1965_vm3, %v1936_v52 }
 0x2d5   :  { %v1813_v38 = vpop.xlane.xlu1 %1812 }
 0x2d6   :  { %v1937_v39 = vadd.f32 %v3915_v58, %v1813_v38 }
 0x2d8   :  { %2001 = vst.msk [vmem:[%s4313_s9 + $0x118] sm:$0xff] %vm1965_vm3, %v1937_v39 }
 0x2d9   :  { %v1816_v40 = vpop.xlane.xlu0 %1815 }
 0x2da   :  { %v1938_v41 = vadd.f32 %v3915_v58, %v1816_v40 }
 0x2dc   :  { %2002 = vst.msk [vmem:[%s4313_s9 + $0x120] sm:$0xff] %vm1965_vm3, %v1938_v41 }
 0x2dd   :  { %v1819_v42 = vpop.xlane.xlu1 %1818 }
 0x2de   :  { %v1939_v43 = vadd.f32 %v3915_v58, %v1819_v42 }
 0x2e0   :  { %2003 = vst.msk [vmem:[%s4313_s9 + $0x128] sm:$0xff] %vm1965_vm3, %v1939_v43 }
 0x2e1   :  { %v1822_v45 = vpop.xlane.xlu0 %1821 }
 0x2e2   :  { %v1940_v46 = vadd.f32 %v3915_v58, %v1822_v45 }
 0x2e4   :  { %2004 = vst.msk [vmem:[%s4313_s9 + $0x130] sm:$0xff] %vm1965_vm3, %v1940_v46 }
 0x2e5   :  { %v1825_v47 = vpop.xlane.xlu1 %1824 }
 0x2e6   :  { %v1941_v48 = vadd.f32 %v3915_v58, %v1825_v47 }
 0x2e8   :  { %2005 = vst.msk [vmem:[%s4313_s9 + $0x138] sm:$0xff] %vm1965_vm3, %v1941_v48 }
 0x2e9   :  { %v1828_v49 = vpop.xlane.xlu0 %1827 }
 0x2ea   :  { %v1942_v50 = vadd.f32 %v3915_v58, %v1828_v49 }
 0x2ec   :  { %2006 = vst.msk [vmem:[%s4313_s9 + $0x140] sm:$0xff] %vm1965_vm3, %v1942_v50 }
 0x2ed   :  { %v1831_v51 = vpop.xlane.xlu1 %1830 }
 0x2ee   :  { %v1943_v53 = vadd.f32 %v3915_v58, %v1831_v51 }
 0x2f0   :  { %2007 = vst.msk [vmem:[%s4313_s9 + $0x148] sm:$0xff] %vm1965_vm3, %v1943_v53 }
 0x2f1   :  { %v1834_v54 = vpop.xlane.xlu0 %1833 }
 0x2f2   :  { %v1944_v55 = vadd.f32 %v3915_v58, %v1834_v54 }
 0x2f4   :  { %2008 = vst.msk [vmem:[%s4313_s9 + $0x150] sm:$0xff] %vm1965_vm3, %v1944_v55 }
 0x2f5   :  { %v1837_v56 = vpop.xlane.xlu1 %1836 }
 0x2f6   :  { %v1945_v57 = vadd.f32 %v3915_v58, %v1837_v56 }
 0x2f8   :  { %2009 = vst.msk [vmem:[%s4313_s9 + $0x158] sm:$0xff] %vm1965_vm3, %v1945_v57 }
 0x2f9   :  { %v1840_v59 = vpop.xlane.xlu0 %1839 }
 0x2fa   :  { %v1946_v60 = vadd.f32 %v3915_v58, %v1840_v59 }
 0x2fc   :  { %2010 = vst.msk [vmem:[%s4313_s9 + $0x160] sm:$0xff] %vm1965_vm3, %v1946_v60 }
 0x2fd   :  { %v1843_v61 = vpop.xlane.xlu1 %1842 }
 0x2fe   :  { %v1947_v62 = vadd.f32 %v3915_v58, %v1843_v61 }
 0x300   :  { %2011 = vst.msk [vmem:[%s4313_s9 + $0x168] sm:$0xff] %vm1965_vm3, %v1947_v62 }
 0x301   :  { %v1846_v63 = vpop.xlane.xlu0 %1845 }
 0x302   :  { %v1948_v1 = vadd.f32 %v3915_v58, %v1846_v63 }
 0x304   :  { %2012 = vst.msk [vmem:[%s4313_s9 + $0x170] sm:$0xff] %vm1965_vm3, %v1948_v1 }
 0x305   :  { %v1849_v2 = vpop.xlane.xlu1 %1848 }
 0x306   :  { %v1949_v4 = vadd.f32 %v3915_v58, %v1849_v2 }
 0x308   :  { %2013 = vst.msk [vmem:[%s4313_s9 + $0x178] sm:$0xff] %vm1965_vm3, %v1949_v4 }
 0x309   :  { %v1852_v5 = vpop.xlane.xlu0 %1851 }
 0x30a   :  { %v1950_v0 = vadd.f32 %v3915_v58, %v1852_v5 }
 0x30c   :  { %2014 = vst.msk [vmem:[%s4313_s9 + $0x180] sm:$0xff] %vm1965_vm3, %v1950_v0 }
 0x30d   :  { %v1855_v6 = vpop.xlane.xlu1 %1854 }
 0x30e   :  { %v1951_v7 = vadd.f32 %v3915_v58, %v1855_v6 }
 0x310   :  { %2015 = vst.msk [vmem:[%s4313_s9 + $0x188] sm:$0xff] %vm1965_vm3, %v1951_v7 }
 0x311   :  { %v1858_v8 = vpop.xlane.xlu0 %1857 }
 0x312   :  { %v1952_v9 = vadd.f32 %v3915_v58, %v1858_v8 }
 0x314   :  { %2016 = vst.msk [vmem:[%s4313_s9 + $0x190] sm:$0xff] %vm1965_vm3, %v1952_v9 }
 0x315   :  { %v1861_v10 = vpop.xlane.xlu1 %1860 }
 0x316   :  { %v1953_v11 = vadd.f32 %v3915_v58, %v1861_v10 }
 0x318   :  { %2017 = vst.msk [vmem:[%s4313_s9 + $0x198] sm:$0xff] %vm1965_vm3, %v1953_v11 }
 0x319   :  { %v1864_v12 = vpop.xlane.xlu0 %1863 }
 0x31a   :  { %v1954_v13 = vadd.f32 %v3915_v58, %v1864_v12 }
 0x31c   :  { %2018 = vst.msk [vmem:[%s4313_s9 + $0x1a0] sm:$0xff] %vm1965_vm3, %v1954_v13 }
 0x31d   :  { %v1867_v14 = vpop.xlane.xlu1 %1866 }
 0x31e   :  { %v1955_v32 = vadd.f32 %v3915_v58, %v1867_v14 }
 0x320   :  { %2019 = vst.msk [vmem:[%s4313_s9 + $0x1a8] sm:$0xff] %vm1965_vm3, %v1955_v32 }
 0x321   :  { %v1870_v15 = vpop.xlane.xlu0 %1869 }
 0x322   :  { %v1956_v16 = vadd.f32 %v3915_v58, %v1870_v15 }
 0x324   :  { %2020 = vst.msk [vmem:[%s4313_s9 + $0x1b0] sm:$0xff] %vm1965_vm3, %v1956_v16 }
 0x325   :  { %v1873_v17 = vpop.xlane.xlu1 %1872 }
 0x326   :  { %v1957_v18 = vadd.f32 %v3915_v58, %v1873_v17 }
 0x328   :  { %2021 = vst.msk [vmem:[%s4313_s9 + $0x1b8] sm:$0xff] %vm1965_vm3, %v1957_v18 }
 0x329   :  { %v1876_v3 = vpop.xlane.xlu0 %1875 }
 0x32a   :  { %v1958_v19 = vadd.f32 %v3915_v58, %v1876_v3 }
 0x32c   :  { %2022 = vst.msk [vmem:[%s4313_s9 + $0x1c0] sm:$0xff] %vm1965_vm3, %v1958_v19 }
 0x32d   :  { %v1879_v20 = vpop.xlane.xlu1 %1878 }
 0x32e   :  { %v1959_v21 = vadd.f32 %v3915_v58, %v1879_v20 }
 0x330   :  { %2023 = vst.msk [vmem:[%s4313_s9 + $0x1c8] sm:$0xff] %vm1965_vm3, %v1959_v21 }
 0x331   :  { %v1882_v22 = vpop.xlane.xlu0 %1881 }
 0x332   :  { %v1960_v23 = vadd.f32 %v3915_v58, %v1882_v22 }
 0x334   :  { %2024 = vst.msk [vmem:[%s4313_s9 + $0x1d0] sm:$0xff] %vm1965_vm3, %v1960_v23 }
 0x335   :  { %v1885_v24 = vpop.xlane.xlu1 %1884 }
 0x336   :  { %v1961_v44 = vadd.f32 %v3915_v58, %v1885_v24 }
 0x338   :  { %2025 = vst.msk [vmem:[%s4313_s9 + $0x1d8] sm:$0xff] %vm1965_vm3, %v1961_v44 }
 0x339   :  { %v1888_v25 = vpop.xlane.xlu0 %1887 }
 0x33a   :  { %v1962_v26 = vadd.f32 %v3915_v58, %v1888_v25 }
 0x33c   :  { %2026 = vst.msk [vmem:[%s4313_s9 + $0x1e0] sm:$0xff] %vm1965_vm3, %v1962_v26 }
 0x33d   :  { %v1891_v27 = vpop.xlane.xlu1 %1890 }
 0x33e   :  { %v1963_v28 = vadd.f32 %v3915_v58, %v1891_v27 }
 0x340   :  { %2027 = vst.msk [vmem:[%s4313_s9 + $0x1e8] sm:$0xff] %vm1965_vm3, %v1963_v28 }
 0x341   :  { %v1894_v29 = vpop.xlane.xlu0 %1893 }
 0x342   :  { %v1964_v30 = vadd.f32 %v3915_v58, %v1894_v29 }
 0x344   :  { %2028 = vst.msk [vmem:[%s4313_s9 + $0x1f0] sm:$0xff] %vm1965_vm3, %v1964_v30 }

</bundles_post_ra>
